<compile_context>
chip_gen: v7x
topology: tpu7x:2x2x1
jax: 0.10.0
libtpu: 0.0.40
codegen_flags: <defaults>
</compile_context>

<pallas_src>
import jax
import jax.numpy as jnp
from jax import lax
from jax.experimental import pallas as pl
from jax.experimental.pallas import tpu as pltpu

_LANE = 128
_SUB = 8


def _round_up(x, m):
    return (x + m - 1) // m * m


def _split_bf16(x_f32):
    """Split f32 -> (hi, lo) bf16 so that hi + lo ~= x to ~2^-16 relative error."""
    hi = x_f32.astype(jnp.bfloat16)
    lo = (x_f32 - hi.astype(jnp.float32)).astype(jnp.bfloat16)
    return hi, lo


def _conv_dot(x_f32, wh, wl):
    """bf16x3 contraction: three native-bf16 MXU passes, f32 accumulation."""
    xh, xl = _split_bf16(x_f32)
    y = jnp.dot(xh, wh, preferred_element_type=jnp.float32)
    y = y + jnp.dot(xh, wl, preferred_element_type=jnp.float32)
    y = y + jnp.dot(xl, wh, preferred_element_type=jnp.float32)
    return y


# ---------------------------------------------------------------------------
# Pass 1: conv matmul (bf16x3) -> per-tile per-channel sum / sum-of-squares.
#   x_ref:     (tile_m, Kp)  folded im2col rows (f32, zero-padded K and M)
#   wh_ref:    (Kp, Cp)      bf16 hi part of folded conv weight
#   wl_ref:    (Kp, Cp)      bf16 lo part of folded conv weight
#   stats_ref: (2, Cp)       row 0 = sum(y), row 1 = sum(y*y)
# ---------------------------------------------------------------------------
def conv_stats_kernel(x_ref, wh_ref, wl_ref, stats_ref):
    y = _conv_dot(x_ref[...], wh_ref[...], wl_ref[...])
    stats_ref[0:1, :] = jnp.sum(y, axis=0, keepdims=True)
    stats_ref[1:2, :] = jnp.sum(y * y, axis=0, keepdims=True)


# ---------------------------------------------------------------------------
# Pass 2: recompute conv matmul, fuse folded-BatchNorm affine + exact GELU.
#   scale_ref: (1, Cp)   gamma * rsqrt(var + eps)
#   shift_ref: (1, Cp)   beta - mean * scale
#   out_ref:   (tile_m, Cp)
# ---------------------------------------------------------------------------
def conv_bn_gelu_kernel(x_ref, wh_ref, wl_ref, scale_ref, shift_ref, out_ref):
    y = _conv_dot(x_ref[...], wh_ref[...], wl_ref[...])
    ya = y * scale_ref[...] + shift_ref[...]
    inv_sqrt2 = jnp.float32(0.7071067811865476)
    out_ref[...] = (0.5 * ya * (1.0 + lax.erf(ya * inv_sqrt2))).astype(out_ref.dtype)


def block2d_forward(x_nchw, weight_oihw, gamma, beta, eps=1e-5, tile_m=512):
    """Forward pass of Block2D. x: (N, Cin, H, W), weight: (Cout, Cin, KH, KW)."""
    N, Cin, H, W = x_nchw.shape
    Cout, Cin_w, KH, KW = weight_oihw.shape
    assert Cin == Cin_w
    ph, pw = KH // 2, KW // 2
    M = N * H * W
    taps = KH * KW
    K = taps * Cin

    # Lane-dense channel / contraction padding.
    Cp = _round_up(max(Cout, _LANE), _LANE)
    if Cout > _LANE:                      # fill the 256-wide MXU N dim on v6e/v7x
        Cp = _round_up(Cout, 2 * _LANE)
    Kp = _round_up(K, _LANE)

    # --- M tiling: keep >= 2 tiles whenever M allows (v7x has 2 TensorCores and
    # the "parallel" M axis is what shards across them), VMEM-budgeted. ---
    tile_m = _round_up(max(tile_m, _SUB), _SUB)
    tile_m = min(tile_m, max(_SUB, _round_up((M + 1) // 2, _SUB)))

    def vmem_est(tm):
        x_io = 2 * tm * Kp * 4                 # double-buffered f32 x_col tile
        w_io = 2 * 2 * Kp * Cp * 2             # hi+lo bf16 weight (conservative x2)
        o_io = 2 * tm * Cp * 4                 # double-buffered f32 output tile
        tmp = tm * Kp * (4 + 2 + 2) + 2 * tm * Cp * 4   # in-kernel temporaries
        return x_io + w_io + o_io + tmp

    # Stay well inside v7x's 64 MiB physical VMEM (and v5e's scoped default).
    while tile_m > _SUB and vmem_est(tile_m) > 40 * 1024 * 1024:
        tile_m = max(_SUB, _round_up(tile_m // 2, _SUB))
    vmem_limit = int(min(64 * 1024 * 1024,
                         max(32 * 1024 * 1024, int(1.5 * vmem_est(tile_m)))))

    Mp = _round_up(M, tile_m)
    num_tiles = Mp // tile_m

    # ---- glue: NCHW -> NHWC, "same" padding, folded im2col (built ONCE) ----
    x_nhwc = jnp.transpose(x_nchw, (0, 2, 3, 1)).astype(jnp.float32)
    xpad = jnp.pad(x_nhwc, ((0, 0), (ph, ph), (pw, pw), (0, 0)))
    cols = []
    for kh in range(KH):
        for kw in range(KW):
            cols.append(xpad[:, kh:kh + H, kw:kw + W, :].reshape(M, Cin))
    x_col = jnp.concatenate(cols, axis=1)                # (M, K), K order = (kh, kw, cin)
    x_col = jnp.pad(x_col, ((0, Mp - M), (0, Kp - K)))   # zero rows/cols: inert

    # OIHW -> (KH, KW, Cin, Cout) -> (K, Cout), same K ordering; bf16 hi/lo split.
    w_k = jnp.transpose(weight_oihw, (2, 3, 1, 0)).reshape(K, Cout).astype(jnp.float32)
    w_k = jnp.pad(w_k, ((0, Kp - K), (0, Cp - Cout)))
    w_hi, w_lo = _split_bf16(w_k)

    common_params = pltpu.CompilerParams(
        dimension_semantics=("parallel",), vmem_limit_bytes=vmem_limit)

    # ---- pass 1: conv + partial stats (only the tiny stats array hits HBM) ----
    stats = pl.pallas_call(
        conv_stats_kernel,
        out_shape=jax.ShapeDtypeStruct((num_tiles, 2, Cp), jnp.float32),
        grid=(num_tiles,),
        in_specs=[
            pl.BlockSpec((tile_m, Kp), lambda i: (i, 0)),
            pl.BlockSpec((Kp, Cp), lambda i: (0, 0)),
            pl.BlockSpec((Kp, Cp), lambda i: (0, 0)),
        ],
        out_specs=pl.BlockSpec((None, 2, Cp), lambda i: (i, 0, 0)),
        compiler_params=common_params,
    )(x_col, w_hi, w_lo)

    # ---- tiny combine of partial stats -> per-channel scale/shift ----
    # Zero-padded M rows contribute 0 to both sums, so dividing by the true M is exact.
    s1 = jnp.sum(stats[:, 0, :], axis=0)                 # (Cp,)
    s2 = jnp.sum(stats[:, 1, :], axis=0)
    mean = s1 / jnp.float32(M)
    var = jnp.maximum(s2 / jnp.float32(M) - mean * mean, 0.0)   # biased variance
    gamma_p = jnp.pad(gamma.astype(jnp.float32), (0, Cp - Cout), constant_values=1.0)
    beta_p = jnp.pad(beta.astype(jnp.float32), (0, Cp - Cout))
    scale = gamma_p * lax.rsqrt(var + jnp.float32(eps))
    shift = beta_p - mean * scale

    # ---- pass 2: recompute conv, fused affine + exact GELU ----
    out_flat = pl.pallas_call(
        conv_bn_gelu_kernel,
        out_shape=jax.ShapeDtypeStruct((Mp, Cp), jnp.float32),
        grid=(num_tiles,),
        in_specs=[
            # On v5e, if the x_col DMA is exposed, add pipeline_mode=pl.Buffered(3) here.
            pl.BlockSpec((tile_m, Kp), lambda i: (i, 0)),
            pl.BlockSpec((Kp, Cp), lambda i: (0, 0)),
            pl.BlockSpec((Kp, Cp), lambda i: (0, 0)),
            pl.BlockSpec((1, Cp), lambda i: (0, 0)),
            pl.BlockSpec((1, Cp), lambda i: (0, 0)),
        ],
        out_specs=pl.BlockSpec((tile_m, Cp), lambda i: (i, 0)),
        compiler_params=common_params,
    )(x_col, w_hi, w_lo, scale.reshape(1, Cp), shift.reshape(1, Cp))

    # (Mp, Cp) -> crop padding -> NHWC -> NCHW
    out_nhwc = out_flat[:M, :Cout].reshape(N, H, W, Cout)
    return jnp.transpose(out_nhwc, (0, 3, 1, 2))


def reference_forward(x_nchw, weight_oihw, gamma, beta, eps=1e-5):
    """Pure-JAX reference mirroring the PyTorch module (training-mode BatchNorm)."""
    KH, KW = weight_oihw.shape[2], weight_oihw.shape[3]
    y = lax.conv_general_dilated(
        x_nchw, weight_oihw, window_strides=(1, 1),
        padding=[(KH // 2, KH // 2), (KW // 2, KW // 2)],
        dimension_numbers=("NCHW", "OIHW", "NCHW"),
    )
    mean = y.mean(axis=(0, 2, 3), keepdims=True)
    var = ((y - mean) ** 2).mean(axis=(0, 2, 3), keepdims=True)
    yn = (y - mean) / jnp.sqrt(var + eps)
    ya = yn * gamma.reshape(1, -1, 1, 1) + beta.reshape(1, -1, 1, 1)
    return jax.nn.gelu(ya, approximate=False)


if __name__ == "__main__":
    # Block2D(in_channels=4, out_channels=8, kernel_size=7) -> conv weight (8,4,7,7)
    N, Cin, H, W = 2, 4, 16, 16
    Cout, Kk = 8, 7

    key = jax.random.PRNGKey(0)
    kx, kw, kg, kb = jax.random.split(key, 4)

    x = jax.random.normal(kx, (N, Cin, H, W), dtype=jnp.float32)
    weight = 0.1 * jax.random.normal(kw, (Cout, Cin, Kk, Kk), dtype=jnp.float32)
    gamma = 1.0 + 0.1 * jax.random.normal(kg, (Cout,), dtype=jnp.float32)
    beta = 0.1 * jax.random.normal(kb, (Cout,), dtype=jnp.float32)

    out = jax.block_until_ready(block2d_forward(x, weight, gamma, beta))
    ref = jax.block_until_ready(reference_forward(x, weight, gamma, beta))

    assert out.shape == (N, Cout, H, W)
    assert jnp.allclose(out, ref, rtol=1e-4, atol=1e-4), \
        f"max abs diff {jnp.max(jnp.abs(out - ref))}"

    print("KERNEL_OK")
</pallas_src>

<mosaic_0001>
module attributes {stable_mosaic.version = 11 : i64} {
  func.func @conv_stats_kernel(%arg0: i32, %arg1: memref<256x256xf32, #tpu.memory_space<vmem>>, %arg2: memref<256x128xbf16, #tpu.memory_space<vmem>>, %arg3: memref<256x128xbf16, #tpu.memory_space<vmem>>, %arg4: memref<1x2x128xf32, #tpu.memory_space<vmem>>) attributes {dimension_semantics = [#tpu.dimension_semantics<parallel>], iteration_bounds = array<i64: 2>, scalar_prefetch = 0 : i64, scratch_operands = 0 : i64, tpu.core_type = #tpu.core_type<tc>, window_params = [{transform_indices = @transform_0, window_bounds = array<i64: 256, 256>}, {pipeline_mode = #tpu.pipeline_mode<synchronous>, transform_indices = @transform_1, window_bounds = array<i64: 256, 128>}, {pipeline_mode = #tpu.pipeline_mode<synchronous>, transform_indices = @transform_2, window_bounds = array<i64: 256, 128>}, {transform_indices = @transform_3, window_bounds = array<i64: 1, 2, 128>}]} {
    %c0 = arith.constant 0 : index
    %c0_0 = arith.constant 0 : index
    %0 = vector.load %arg1[%c0, %c0_0] : memref<256x256xf32, #tpu.memory_space<vmem>>, vector<256x256xf32>
    %c0_1 = arith.constant 0 : index
    %c0_2 = arith.constant 0 : index
    %1 = vector.load %arg2[%c0_1, %c0_2] : memref<256x128xbf16, #tpu.memory_space<vmem>>, vector<256x128xbf16>
    %c0_3 = arith.constant 0 : index
    %c0_4 = arith.constant 0 : index
    %2 = vector.load %arg3[%c0_3, %c0_4] : memref<256x128xbf16, #tpu.memory_space<vmem>>, vector<256x128xbf16>
    %3 = arith.truncf %0 : vector<256x256xf32> to vector<256x256xbf16>
    %4 = arith.extf %3 : vector<256x256xbf16> to vector<256x256xf32>
    %5 = arith.subf %0, %4 : vector<256x256xf32>
    %6 = arith.truncf %5 : vector<256x256xf32> to vector<256x256xbf16>
    %cst = arith.constant dense<0.000000e+00> : vector<256x128xf32>
    %7 = tpu.matmul %3, %1, %cst {dimension_numbers = #tpu.dot_dimension_numbers<[1], [0], [0], [1], [0, 0, 1, 1], [], []>} : vector<256x256xbf16>, vector<256x128xbf16>, vector<256x128xf32> -> vector<256x128xf32>
    %cst_5 = arith.constant dense<0.000000e+00> : vector<256x128xf32>
    %8 = tpu.matmul %3, %2, %cst_5 {dimension_numbers = #tpu.dot_dimension_numbers<[1], [0], [0], [1], [0, 0, 1, 1], [], []>} : vector<256x256xbf16>, vector<256x128xbf16>, vector<256x128xf32> -> vector<256x128xf32>
    %9 = arith.addf %7, %8 : vector<256x128xf32>
    %cst_6 = arith.constant dense<0.000000e+00> : vector<256x128xf32>
    %10 = tpu.matmul %6, %1, %cst_6 {dimension_numbers = #tpu.dot_dimension_numbers<[1], [0], [0], [1], [0, 0, 1, 1], [], []>} : vector<256x256xbf16>, vector<256x128xbf16>, vector<256x128xf32> -> vector<256x128xf32>
    %11 = arith.addf %9, %10 : vector<256x128xf32>
    %cst_7 = arith.constant dense<0.000000e+00> : vector<128xf32>
    %12 = vector.multi_reduction <add>, %11, %cst_7 [0] : vector<256x128xf32> to vector<128xf32>
    %13 = vector.shape_cast %12 : vector<128xf32> to vector<1x128xf32>
    %c0_8 = arith.constant 0 : index
    %c0_9 = arith.constant 0 : index
    %c0_10 = arith.constant 0 : index
    %14 = vector.load %arg4[%c0_8, %c0_9, %c0_10] : memref<1x2x128xf32, #tpu.memory_space<vmem>>, vector<1x1x128xf32>
    %15 = vector.shape_cast %14 : vector<1x1x128xf32> to vector<1x128xf32>
    %16 = vector.shape_cast %13 : vector<1x128xf32> to vector<1x1x128xf32>
    tpu.vector_store %arg4[%c0_8, %c0_9, %c0_10], %16 {strides = array<i32>} : memref<1x2x128xf32, #tpu.memory_space<vmem>>, vector<1x1x128xf32>,
    %17 = arith.mulf %11, %11 : vector<256x128xf32>
    %cst_11 = arith.constant dense<0.000000e+00> : vector<128xf32>
    %18 = vector.multi_reduction <add>, %17, %cst_11 [0] : vector<256x128xf32> to vector<128xf32>
    %19 = vector.shape_cast %18 : vector<128xf32> to vector<1x128xf32>
    %c0_12 = arith.constant 0 : index
    %c1 = arith.constant 1 : index
    %c0_13 = arith.constant 0 : index
    %20 = vector.load %arg4[%c0_12, %c1, %c0_13] : memref<1x2x128xf32, #tpu.memory_space<vmem>>, vector<1x1x128xf32>
    %21 = vector.shape_cast %20 : vector<1x1x128xf32> to vector<1x128xf32>
    %22 = vector.shape_cast %19 : vector<1x128xf32> to vector<1x1x128xf32>
    tpu.vector_store %arg4[%c0_12, %c1, %c0_13], %22 {strides = array<i32>} : memref<1x2x128xf32, #tpu.memory_space<vmem>>, vector<1x1x128xf32>,
    return
  }
  func.func @transform_0(%arg0: i32) -> (i32, i32) {
    %c0_i32 = arith.constant 0 : i32
    %c0_i32_0 = arith.constant 0 : i32
    return %arg0, %c0_i32 : i32, i32
  }
  func.func @transform_1(%arg0: i32) -> (i32, i32) {
    %c0_i32 = arith.constant 0 : i32
    %c0_i32_0 = arith.constant 0 : i32
    %c0_i32_1 = arith.constant 0 : i32
    return %c0_i32, %c0_i32_0 : i32, i32
  }
  func.func @transform_2(%arg0: i32) -> (i32, i32) {
    %c0_i32 = arith.constant 0 : i32
    %c0_i32_0 = arith.constant 0 : i32
    %c0_i32_1 = arith.constant 0 : i32
    return %c0_i32, %c0_i32_0 : i32, i32
  }
  func.func @transform_3(%arg0: i32) -> (i32, i32, i32) {
    %c0_i32 = arith.constant 0 : i32
    %c0_i32_0 = arith.constant 0 : i32
    %c0_i32_1 = arith.constant 0 : i32
    return %arg0, %c0_i32, %c0_i32_0 : i32, i32, i32
  }
}

</mosaic_0001>

<bundles_post_ra>
// kernel: tpu_custom_call.1
= control target key start
LH: loop header
LB: loop body
LE: loop exit
PB: predicated region body
PF: predicated region fallthrough
CT: control target
= control target key end

     0   :  { %8 = vsyncpa [#allocation3], 0  ;;  %s3028_s0 = inlined_call_operand.hbm [shape: f32[512,256], index: 0, kind: input, shape index: {}]   ;;  %s3029_s1 = inlined_call_operand.hbm [shape: bf16[256,128], index: 1, kind: input, shape index: {}]   ;;  %s3030_s2 = inlined_call_operand.hbm [shape: bf16[256,128], index: 2, kind: input, shape index: {}]   ;;  %s3031_s3 = inlined_call_operand.hbm [shape: f32[2,2,128], index: 3, kind: output, shape index: {}]  }
   0x1   :  { %10 = vsyncpa [#allocation3 + $0x1], 0 }
   0x2   :  { %11 = vsyncpa [#allocation6], 0 }
   0x3   :  { %12 = vsyncpa [#allocation4], 0 }
   0x4   :  { %14 = vsyncpa [#allocation4 + $0x1], 0  ;;  %s2152_s12 = smov 0   ;;  %s2154_s13 = smov 0  }
   0x5   :  { %s2156_s14 = smov 0   ;;  %s2158_s15 = smov 0  }
   0x6 LB: > { %s2173_s16 = sadd.s32 4294967295, %s2122_s15   ;;  %s1459_s17 = sadd.s32 4294967294, %s2122_s15   ;;  %s2122_s15 = sphi %s2158_s15, %s3199_s15   ;;  %s2118_s14 = sphi %s2156_s14, %s3198_s14   ;;  %s2114_s13 = sphi %s2154_s13, %s3197_s13   ;;  %s2110_s12 = sphi %s2152_s12, %s3196_s12  }
   0x7   : > { %p40_p0 = scmp.ne.s32.totalorder %s2114_s13, %s2110_s12  ;;  %p3032_p1 = scmp.eq.s32.totalorder %s2173_s16, 0 }
   0x8   : > { %p112_p3 = scmp.eq.s32.totalorder %s1459_s17, 1  ;;  %p1460_p5 = scmp.ge.s32.totalorder %s2122_s15, 1 }
   0x9   : > { %p2182_p4 = por %p3032_p1, %p40_p0  ;;  %p119_p7 = scmp.lt.s32.totalorder %s2122_s15, 3 }
   0xa   : > { %p2187_p6 = por %p112_p3, %p40_p0  ;;  %s2124_s21 = smov [#allocation5]  }
   0xb   : > { %s3079_s18 = scalar_select %p2182_p4, 1, 0 }
   0xc   : > { %s3080_s19 = scalar_select %p2187_p6, 1, 0 }
   0xd   : > { %p2192_p8 = pnand %p1460_p5, %p119_p7  ;;  %s131_s22 = sshll.u32 %s2124_s21, 4  ;;  %s2196_s22 = int_to_ptr.vmem [resolvable:$true] %s131_s22 }
   0xe   : > { %s2125_s24 = smov [#allocation7]   ;;  %s1966_s28 = scalar_lea.hbm %s3029_s1, 2048 }
   0xf   : > { %p1875_p9 = pneg %p2192_p8  ;;  %s144_s25 = sshll.u32 %s2125_s24, 4  ;;  %s2207_s25 = int_to_ptr.vmem [resolvable:$true] %s144_s25 }
  0x10   : > { %p1967_p12 = scmp.ne.s32.totalorder %s3029_s1, %s1966_s28  ;;  %p1973_p5 = scmp.lt.u32.totalorder %s1966_s28, %s3029_s1 }
  0x11   : > { %p2203_p11 = pnand %p1875_p9, %p3032_p1 }
  0x13   : > { %p1968_p13 = pneg %p2203_p11 }
  0x15   : > { %p1969_p0 = pnand %p1968_p13, %p1967_p12 }
  0x17   : > { %p1970_p3 = pneg %p1969_p0 }
  0x19   : > { %p1975_p7 = pnand %p1973_p5, %p1970_p3 }
  0x1b   : > { %1978 = shalt.err (!%p1975_p7)
}
  0x1c   : > { %s1979_s6 = scalar_lea.vmem %s2196_s22, 2048  ;;  %p1987_p2 = scmp.lt.s32.totalorder %s2196_s22, %s2196_s22 }
  0x1d   : > { %p1980_p9 = scmp.ne.s32.totalorder %s2196_s22, %s1979_s6  ;;  %p1988_p12 = scmp.lt.s32.totalorder %s1979_s6, %s1979_s6 }
  0x1f   : > { %p1982_p10 = pnand %p1980_p9, %p1968_p13  ;;  %p1989_p0 = por %p1988_p12, %p1987_p2 }
  0x21   : > { %p1983_p1 = pneg %p1982_p10 }
  0x23   : > { %p1990_p6 = pnand %p1989_p0, %p1983_p1 }
  0x25   : > { %1993 = shalt.err (!%p1990_p6)
}
  0x26   : > { %s2126_s7 = smov 64   ;;  %s2127_s8 = smov 4  }
  0x27   : > { %1878 = dma.hbm_to_vmem [thread:$0]  (!%p2203_p11), %s3029_s1, 2048, %s2196_s22, [#allocation6], %s2126_s7, %s2126_s7, %s2127_s8  }
  0x28   : > { %s1994_s21 = scalar_lea.hbm %s3030_s2, 2048 }
  0x29   : > { %p1995_p2 = scmp.ne.s32.totalorder %s3030_s2, %s1994_s21  ;;  %p2001_p10 = scmp.lt.u32.totalorder %s1994_s21, %s3030_s2 }
  0x2b   : > { %p1997_p1 = pnand %p1995_p2, %p1968_p13 }
  0x2d   : > { %p1998_p6 = pneg %p1997_p1 }
  0x2f   : > { %p2003_p3 = pnand %p2001_p10, %p1998_p6 }
  0x31   : > { %2006 = shalt.err (!%p2003_p3)
}
  0x32   : > { %s2007_s22 = scalar_lea.vmem %s2207_s25, 2048  ;;  %p2015_p12 = scmp.lt.s32.totalorder %s2207_s25, %s2207_s25 }
  0x33   : > { %p2008_p5 = scmp.ne.s32.totalorder %s2207_s25, %s2007_s22  ;;  %p2016_p0 = scmp.lt.s32.totalorder %s2007_s22, %s2007_s22 }
  0x35   : > { %p2010_p7 = pnand %p2008_p5, %p1968_p13  ;;  %p2017_p2 = por %p2016_p0, %p2015_p12 }
  0x37   : > { %p2011_p9 = pneg %p2010_p7 }
  0x39   : > { %p2018_p1 = pnand %p2017_p2, %p2011_p9 }
  0x3b   : > { %2021 = shalt.err (!%p2018_p1)
}
  0x3c   : > { %1881 = dma.hbm_to_vmem [thread:$0]  (!%p2203_p11), %s3030_s2, 2048, %s2207_s25, [#allocation6], %s2126_s7, %s2126_s7, %s2127_s8  }
  0x3d   : > { %s2262_s4 = sadd.s32 1, %s2122_s15   ;;  %s27_s23 = sadd.s32 1, %s2118_s14 }
  0x3e   : > { %s24_s5 = ssub.s32 %s2122_s15, %s2262_s4  ;;  %p34_p13 = scmp.ne.s32.totalorder %s2118_s14, %s2114_s13 }
  0x3f   : > { %p25_p6 = scmp.eq.s32.totalorder %s24_s5, 0  ;;  %p35_p10 = scmp.eq.s32.totalorder %s2122_s15, 0 }
  0x40   : > { %p3083_p3 = scmp.eq.s32.totalorder %s2173_s16, 1  ;;  %p1892_p7 = scmp.lt.s32.totalorder %s2122_s15, 2 }
  0x41   : > { %s2278_s9 = scalar_select %p25_p6, %s2118_s14, %s27_s23  }
  0x42   : > { %p2272_p5 = por %p3083_p3, %p34_p13  ;;  %p36_p9 = por %p35_p10, %p34_p13 }
  0x43   : > { %s158_s10 = sand.u32 1, %s2118_s14   ;;  %s1510_s25 = sshll.u32 %s2122_s15, 13 }
  0x44   : > { %s3084_s6 = scalar_select %p2272_p5, 1, 0 }
  0x45   : > { %s1464_s11 = sshll.u32 %s158_s10, 9  ;;  %s2285_s17 = scalar_lea.hbm %s3028_s0, %s1510_s25 }
  0x46   : > { %s162_s21 = scalar_lea.vmem [#allocation2], %s1464_s11  ;;  %p2289_p11 = pnand %p1892_p7, %p36_p9 }
  0x47   : > { %s170_s24 = sshll.u32 %s162_s21, 4  ;;  %s2293_s27 = scalar_lea.sflag [#allocation3], %s158_s10  ;;  %s2287_s24 = int_to_ptr.vmem [resolvable:$true] %s170_s24 }
  0x48   : > { %s2022_s28 = scalar_lea.hbm %s2285_s17, 8192  ;;  %p2024_p0 = pneg %p2289_p11 }
  0x49   : > { %p2023_p12 = scmp.ne.s32.totalorder %s2285_s17, %s2022_s28  ;;  %s2027_s30 = scalar_lea.hbm %s3028_s0, 16384 }
  0x4a   : > { %p2028_p13 = scmp.lt.u32.totalorder %s2285_s17, %s3028_s0  ;;  %p2029_p6 = scmp.lt.u32.totalorder %s2027_s30, %s2022_s28 }
  0x4b   : > { %p2025_p2 = pnand %p2024_p0, %p2023_p12  ;;  %p2031_p3 = scmp.lt.u32.totalorder %s2022_s28, %s2285_s17 }
  0x4c   : > { %p2030_p10 = por %p2029_p6, %p2028_p13 }
  0x4d   : > { %p2026_p1 = pneg %p2025_p2 }
  0x4e   : > { %p2032_p7 = por %p2031_p3, %p2030_p10 }
  0x50   : > { %p2033_p9 = pnand %p2032_p7, %p2026_p1 }
  0x52   : > { %2036 = shalt.err (!%p2033_p9)
}
  0x53   : > { %s2037_s10 = scalar_lea.vmem %s2287_s24, 8192  ;;  %s2128_s11 = smov [#allocation2]  }
  0x54   : > { %p2038_p12 = scmp.ne.s32.totalorder %s2287_s24, %s2037_s10  ;;  %s2042_s25 = sshll.u32 %s2128_s11, 4  ;;  %s2043_s25 = int_to_ptr.vmem [resolvable:$false] %s2042_s25 }
  0x55   : > { %s2044_s7 = scalar_lea.vmem %s2043_s25, 16384  ;;  %p2045_p4 = scmp.lt.s32.totalorder %s2287_s24, %s2043_s25 }
  0x56   : > { %p2040_p2 = pnand %p2038_p12, %p2024_p0  ;;  %p2046_p13 = scmp.lt.s32.totalorder %s2044_s7, %s2037_s10 }
  0x58   : > { %p2041_p5 = pneg %p2040_p2  ;;  %p2047_p6 = por %p2046_p13, %p2045_p4 }
  0x5a   : > { %p2048_p10 = pnand %p2047_p6, %p2041_p5 }
  0x5c   : > { %2051 = shalt.err (!%p2048_p10)
}
  0x5d   : > { %s2129_s8 = smov 256   ;;  %s2130_s21 = smov 16  }
  0x5e   : > { %1885 = dma.hbm_to_vmem [thread:$0]  (!%p2289_p11), %s2285_s17, 8192, %s2287_s24, %s2293_s27, %s2129_s8, %s2129_s8, %s2130_s21  }
  0x5f   : > { %182 = sbr.rel (%p2192_p8) target bundleno = 577 (0x241), region = 32 }
  0x66   : > { %s2324_s28 = sand.u32 1, %s2114_s13   ;;  %p3086_p4 = scmp.ne.s32.totalorder %s3079_s18, 0 }
  0x67   : > { %s1469_s22 = sshll.u32 %s2324_s28, 9  ;;  %s185_s29 = scalar_lea.sflag [#allocation3], %s2324_s28 }
  0x68   : > { %s2328_s30 = scalar_lea.vmem [#allocation2], %s1469_s22 }
  0x69   : > { %2097 = dma.done.wait (%p3086_p4), %s185_s29, 8192  }
  0x6a   : > { %2099 = vsyncadd (%p3086_p4), %s185_s29, 4294959104  ;;  %p3087_p5 = scmp.eq.s32.totalorder %s2173_s16, 0 }
  0x6c   : > { %2101 = dma.done.wait (%p3087_p5), [#allocation6], 4096   ;;  %p3088_p8 = pmov %p3087_p5 }
  0x6d   : > { %v1934_v0 = vld [vmem:[#allocation7 + $0x40] sm:$0xff]   ;;  %v1936_v2 = vld [vmem:[#allocation7 + $0x48] sm:$0xff]   ;;  %v1938_v4 = vld [vmem:[#allocation7 + $0x50] sm:$0xff]   ;;  %s1472_s18 = sshll.u32 %s2324_s28, 1  ;;  %s1506_s20 = sshll.u32 %s2173_s16, 5 }
  0x6e   : > { %2103 = vsyncadd (%p3088_p8), [#allocation6], 4294963200  ;;  %v1935_v1 = vld [vmem:[#allocation7] sm:$0xff]   ;;  %1511 = vmatprep.subr.bf16.mxu0 %v1934_v0  ;;  %1847 = vmatprep.subr.bf16.mxu1 %v1934_v0  ;;  %v1937_v3 = vld [vmem:[#allocation7 + $0x8] sm:$0xff]   ;;  %s218_s17 = scalar_lea.vmem [#allocation8], %s1472_s18  ;;  %s2984_s23 = scalar_lea.hbm %s3031_s3, %s1506_s20 }
  0x6f   : > { %1512 = vmatpush3.bf16.msra.mxu0 %v1935_v1  ;;  %1855 = vmatpush3.bf16.msra.mxu1 %v1935_v1  ;;  %v1939_v5 = vld [vmem:[#allocation7 + $0x10] sm:$0xff]   ;;  %v1940_v6 = vld [vmem:[#allocation7 + $0x58] sm:$0xff]   ;;  %v1942_v8 = vld [vmem:[#allocation7 + $0x60] sm:$0xff]   ;;  %s1370_s24 = sshll.u32 %s218_s17, 4  ;;  %s1357_s5 = scalar_lea.sflag [#allocation4], %s2324_s28  ;;  %s2986_s24 = int_to_ptr.vmem [resolvable:$true] %s1370_s24 }
  0x70   : > { %1513 = vmatprep.subr.bf16.mxu0 %v1936_v2  ;;  %1848 = vmatprep.subr.bf16.mxu1 %v1936_v2  ;;  %v1941_v7 = vld [vmem:[#allocation7 + $0x18] sm:$0xff]   ;;  %v1943_v9 = vld [vmem:[#allocation7 + $0x20] sm:$0xff]   ;;  %v1944_v10 = vld [vmem:[#allocation7 + $0x68] sm:$0xff]   ;;  %s2052_s10 = scalar_lea.vmem %s2986_s24, 32  ;;  %p3193_p0 = scmp.ne.s32.totalorder %s3084_s6, 0 }
  0x71   : > { %v222_v11 = vld [vmem:[%s2328_s30 + $0x8] sm:$0xff]  ;;  %v224_v12 = vld [vmem:[%s2328_s30 + $0x18] sm:$0xff]  ;;  %v1946_v20 = vld [vmem:[#allocation7 + $0x70] sm:$0xff]   ;;  %p2053_p11 = scmp.ne.s32.totalorder %s2986_s24, %s2052_s10  ;;  %s2131_s16 = smov [#allocation8]  }
  0x72   : > { %v254_v13 = vld [vmem:[%s2328_s30 + $0x108] sm:$0xff]  ;;  %v2341_v14 = vpack.c.bf16 %v224_v12, %v222_v11  ;;  %v256_v15 = vld [vmem:[%s2328_s30 + $0x118] sm:$0xff]  ;;  %v1947_v23 = vld [vmem:[#allocation7 + $0x30] sm:$0xff]   ;;  %s2056_s11 = sshll.u32 %s2131_s16, 4  ;;  %s2057_s11 = int_to_ptr.vmem [resolvable:$false] %s2056_s11 }
  0x73   : > { %1514 = vmatpush3.bf16.msra.mxu0 %v1937_v3  ;;  %1856 = vmatpush3.bf16.msra.mxu1 %v1937_v3  ;;  %v2344_v16 = vpack.c.bf16 %v256_v15, %v254_v13  ;;  %v1945_v17 = vld [vmem:[#allocation7 + $0x28] sm:$0xff]   ;;  %v1948_v25 = vld [vmem:[#allocation7 + $0x78] sm:$0xff]   ;;  %v2357_v27 = vld [vmem:[%s2328_s30] sm:$0xff]  ;;  %p2054_p1 = pnand %p2053_p11, %p3193_p0  ;;  %s2058_s25 = scalar_lea.vmem %s2057_s11, 64 }
  0x74   : > { %1515 = vmatprep.subr.bf16.mxu0 %v1938_v4  ;;  %1849 = vmatprep.subr.bf16.mxu1 %v1938_v4  ;;  %v382_v18 = vunpack.c.l.bf16 %v2341_v14  ;;  %v384_v19 = vunpack.c.h.bf16 %v2341_v14  ;;  %v1949_v26 = vld [vmem:[#allocation7 + $0x38] sm:$0xff]   ;;  %v2360_v28 = vld [vmem:[%s2328_s30 + $0x10] sm:$0xff]  ;;  %v253_v29 = vld [vmem:[%s2328_s30 + $0x100] sm:$0xff]  ;;  %p2059_p7 = scmp.lt.s32.totalorder %s2986_s24, %s2057_s11  ;;  %p2060_p9 = scmp.lt.s32.totalorder %s2058_s25, %s2052_s10 }
  0x75   : > { %3089 = vst [vmem:[#allocation12_spill] sm:$0xff] %v2344_v16  ;;  %669 = vmatprep.mubr.bf16.mxu0 %v2341_v14  ;;  %733 = vmatprep.mubr.bf16.mxu1 %v2344_v16  ;;  %v255_v30 = vld [vmem:[%s2328_s30 + $0x110] sm:$0xff]  ;;  %v1950_v31 = vld [vmem:[#allocation5 + $0x40] sm:$0xff]   ;;  %v2365_v32 = vld [vmem:[%s2328_s30 + $0x28] sm:$0xff]  ;;  %v414_v34 = vunpack.c.l.bf16 %v2344_v16  ;;  %v416_v37 = vunpack.c.h.bf16 %v2344_v16  ;;  %v2376_v38 = vpack.c.bf16 %v2360_v28, %v2357_v27  ;;  %p2055_p3 = pneg %p2054_p1 }
  0x76   : > { %v2350_v21 = vsub.f32 %v222_v11, %v382_v18  ;;  %v2352_v22 = vsub.f32 %v224_v12, %v384_v19  ;;  %v2368_v33 = vld [vmem:[%s2328_s30 + $0x38] sm:$0xff]  ;;  %v258_v35 = vld [vmem:[%s2328_s30 + $0x128] sm:$0xff]  ;;  %v2378_v39 = vpack.c.bf16 %v255_v30, %v253_v29  ;;  %v1951_v41 = vld [vmem:[#allocation5] sm:$0xff]   ;;  %p2061_p12 = por %p2060_p9, %p2059_p7 }
  0x77   : > { %1516 = vmatpush3.bf16.msra.mxu0 %v1939_v5  ;;  %1857 = vmatpush3.bf16.msra.mxu1 %v1939_v5  ;;  %v260_v36 = vld [vmem:[%s2328_s30 + $0x138] sm:$0xff]  ;;  %v2380_v40 = vsub.f32 %v254_v13, %v414_v34  ;;  %v2382_v42 = vsub.f32 %v256_v15, %v416_v37  ;;  %v2386_v43 = vpack.c.bf16 %v2368_v33, %v2365_v32  ;;  %v2391_v45 = vld [vmem:[%s2328_s30 + $0x20] sm:$0xff]  ;;  %v2394_v46 = vld [vmem:[%s2328_s30 + $0x30] sm:$0xff] }
  0x78   : > { %1517 = vmatprep.subr.bf16.mxu0 %v1940_v6  ;;  %1850 = vmatprep.subr.bf16.mxu1 %v1940_v6  ;;  %3090 = vst [vmem:[#allocation13_spill] sm:$0xff] %v2378_v39  ;;  %v2388_v44 = vpack.c.bf16 %v260_v36, %v258_v35  ;;  %v1952_v47 = vld [vmem:[#allocation5 + $0x48] sm:$0xff]   ;;  %v413_v48 = vunpack.c.l.bf16 %v2378_v39  ;;  %v257_v49 = vld [vmem:[%s2328_s30 + $0x120] sm:$0xff]  ;;  %v259_v50 = vld [vmem:[%s2328_s30 + $0x130] sm:$0xff]  ;;  %v415_v55 = vunpack.c.h.bf16 %v2378_v39  ;;  %v2422_v60 = vpack.c.bf16 %v2394_v46, %v2391_v45  ;;  %p2062_p2 = pnand %p2061_p12, %p2055_p3 }
  0x79   : > { %3091 = vst [vmem:[#allocation14_spill] sm:$0xff] %v2380_v40  ;;  %3092 = vst [vmem:[#allocation15_spill] sm:$0xff] %v2382_v42  ;;  %v1953_v52 = vld [vmem:[#allocation5 + $0x8] sm:$0xff]   ;;  %v2407_v54 = vld [vmem:[%s2328_s30 + $0x58] sm:$0xff]  ;;  %v2424_v61 = vpack.c.bf16 %v259_v50, %v257_v49 }
  0x7a   : > { %3093 = vst [vmem:[#allocation16_spill] sm:$0xff] %v2388_v44  ;;  %v2404_v53 = vld [vmem:[%s2328_s30 + $0x48] sm:$0xff]  ;;  %v2416_v57 = vld [vmem:[%s2328_s30 + $0x158] sm:$0xff]  ;;  %v1954_v58 = vld [vmem:[#allocation5 + $0x50] sm:$0xff]   ;;  %v2418_v59 = vsub.f32 %v253_v29, %v413_v48  ;;  %v2434_v0 = vsub.f32 %v255_v30, %v415_v55  ;;  %v418_v1 = vunpack.c.l.bf16 %v2388_v44  ;;  %v420_v2 = vunpack.c.h.bf16 %v2388_v44 }
  0x7b   : > { %1518 = vmatpush3.bf16.msra.mxu0 %v1941_v7  ;;  %1858 = vmatpush3.bf16.msra.mxu1 %v1941_v7  ;;  %v2413_v56 = vld [vmem:[%s2328_s30 + $0x148] sm:$0xff]  ;;  %3095 = vst [vmem:[#allocation18_spill] sm:$0xff] %v2424_v61  ;;  %v2428_v62 = vpack.c.bf16 %v2407_v54, %v2404_v53  ;;  %v1955_v3 = vld [vmem:[#allocation5 + $0x10] sm:$0xff]   ;;  %v2439_v4 = vld [vmem:[%s2328_s30 + $0x40] sm:$0xff]  ;;  %v417_v19 = vunpack.c.l.bf16 %v2424_v61 }
  0x7c   : > { %1519 = vmatprep.subr.bf16.mxu0 %v1942_v8  ;;  %1851 = vmatprep.subr.bf16.mxu1 %v1942_v8  ;;  %3094 = vst [vmem:[#allocation17_spill] sm:$0xff] %v2418_v59  ;;  %v2432_v63 = vpack.c.bf16 %v2416_v57, %v2413_v56  ;;  %3097 = vst [vmem:[#allocation20_spill] sm:$0xff] %v2434_v0  ;;  %v2442_v5 = vld [vmem:[%s2328_s30 + $0x50] sm:$0xff]  ;;  %v261_v6 = vld [vmem:[%s2328_s30 + $0x140] sm:$0xff]  ;;  %v2458_v12 = vsub.f32 %v258_v35, %v418_v1 }
  0x7d   : > { %v263_v7 = vld [vmem:[%s2328_s30 + $0x150] sm:$0xff]  ;;  %v1956_v8 = vld [vmem:[#allocation5 + $0x58] sm:$0xff]   ;;  %v2460_v13 = vsub.f32 %v260_v36, %v420_v2  ;;  %v2463_v15 = vld [vmem:[%s2328_s30 + $0x168] sm:$0xff]  ;;  %v2487_v36 = vsub.f32 %v257_v49, %v417_v19 }
  0x7e   : > { %3096 = vst [vmem:[#allocation19_spill] sm:$0xff] %v2432_v63  ;;  %v2456_v11 = vld [vmem:[%s2328_s30 + $0x78] sm:$0xff]  ;;  %3098 = vst [vmem:[#allocation21_spill] sm:$0xff] %v2458_v12  ;;  %v2476_v29 = vpack.c.bf16 %v263_v7, %v261_v6  ;;  %v422_v34 = vunpack.c.l.bf16 %v2432_v63  ;;  %v1959_v35 = vld [vmem:[#allocation5 + $0x20] sm:$0xff]  }
  0x7f   : > { %1520 = vmatpush3.bf16.msra.mxu0 %v1943_v9  ;;  %1859 = vmatpush3.bf16.msra.mxu1 %v1943_v9  ;;  %3099 = vst [vmem:[#allocation22_spill] sm:$0xff] %v2460_v13  ;;  %v1957_v18 = vld [vmem:[#allocation5 + $0x18] sm:$0xff]   ;;  %3102 = vst [vmem:[#allocation25_spill] sm:$0xff] %v2487_v36  ;;  %v265_v48 = vld [vmem:[%s2328_s30 + $0x160] sm:$0xff] }
  0x80   : > { %1521 = vmatprep.subr.bf16.mxu0 %v1944_v10  ;;  %1852 = vmatprep.subr.bf16.mxu1 %v1944_v10  ;;  %v2451_v10 = vld [vmem:[%s2328_s30 + $0x68] sm:$0xff]  ;;  %3100 = vst [vmem:[#allocation23_spill] sm:$0xff] %v2476_v29  ;;  %v421_v2 = vunpack.c.l.bf16 %v2476_v29  ;;  %v271_v24 = vld [vmem:[%s2328_s30 + $0x190] sm:$0xff] }
  0x81   : > { %v2480_v30 = vpack.c.bf16 %v2456_v11, %v2451_v10  ;;  %v1960_v55 = vld [vmem:[#allocation5 + $0x68] sm:$0xff]  }
  0x82   : > { %v2503_v49 = vld [vmem:[%s2328_s30 + $0x88] sm:$0xff]  ;;  %v2528_v9 = vsub.f32 %v261_v6, %v421_v2  ;;  %v1963_v6 = vld [vmem:[#allocation5 + $0x30] sm:$0xff]  }
  0x83   : > { %1522 = vmatpush3.bf16.msra.mxu0 %v1945_v17  ;;  %1860 = vmatpush3.bf16.msra.mxu1 %v1945_v17  ;;  %v2466_v17 = vld [vmem:[%s2328_s30 + $0x178] sm:$0xff]  ;;  %v270_v1 = vld [vmem:[%s2328_s30 + $0x188] sm:$0xff] }
  0x84   : > { %1523 = vmatprep.subr.bf16.mxu0 %v1946_v20  ;;  %1853 = vmatprep.subr.bf16.mxu1 %v1946_v20  ;;  %v419_v20 = vunpack.c.h.bf16 %v2424_v61  ;;  %v1961_v19 = vld [vmem:[#allocation5 + $0x28] sm:$0xff]   ;;  %3107 = vst [vmem:[#allocation30_spill] sm:$0xff] %v2528_v9 }
  0x86   : > { %v2489_v37 = vsub.f32 %v259_v50, %v419_v20  ;;  %v2506_v50 = vld [vmem:[%s2328_s30 + $0x98] sm:$0xff] }
  0x87   : > { %1524 = vmatpush3.bf16.msra.mxu0 %v1947_v23  ;;  %1861 = vmatpush3.bf16.msra.mxu1 %v1947_v23  ;;  %v1958_v23 = vld [vmem:[#allocation5 + $0x60] sm:$0xff]  }
  0x88   : > { %1525 = vmatprep.subr.bf16.mxu0 %v1948_v25  ;;  %1854 = vmatprep.subr.bf16.mxu1 %v1948_v25  ;;  %3103 = vst [vmem:[#allocation26_spill] sm:$0xff] %v2489_v37 }
  0x8b   : > { %1526 = vmatpush3.bf16.msra.mxu0 %v1949_v26  ;;  %1862 = vmatpush3.bf16.msra.mxu1 %v1949_v26  ;;  %v2474_v26 = vpack.c.bf16 %v2442_v5, %v2439_v4 }
  0x8c   : > { %1623 = vmatprep.subr.bf16.mxu1 %v1950_v31  ;;  %1735 = vmatprep.subr.bf16.mxu0 %v1950_v31  ;;  %v2484_v31 = vpack.c.bf16 %v2466_v17, %v2463_v15 }
  0x8e   : > { %670 = vmatmul.mubr.bf16.vlgmr.msra.gmra.mrb[0].mxu0 %v2376_v38  ;;  %734 = vmatmul.mubr.bf16.vlgmr.msra.gmra.mrb[0].mxu1 %v2378_v39  ;;  %3101 = vst [vmem:[#allocation24_spill] sm:$0xff] %v2484_v31  ;;  %v428_v2 = vunpack.c.h.bf16 %v2484_v31 }
  0x8f   : > { %1624 = vmatpush3.bf16.msra.mxu1 %v1951_v41  ;;  %1736 = vmatpush3.bf16.msra.mxu0 %v1951_v41  ;;  %v2492_v41 = vld [vmem:[%s2328_s30 + $0x60] sm:$0xff] }
  0x90   : > { %677 = vmatprep.mubr.bf16.mxu0 %v2386_v43  ;;  %741 = vmatprep.mubr.bf16.mxu1 %v2388_v44  ;;  %v2559_v9 = vsub.f32 %v2466_v17, %v428_v2  ;;  %v274_v17 = vld [vmem:[%s2328_s30 + $0x1a8] sm:$0xff]  ;;  %v276_v2 = vld [vmem:[%s2328_s30 + $0x1b8] sm:$0xff] }
  0x91   : > { %1625 = vmatprep.subr.bf16.mxu1 %v1952_v47  ;;  %1737 = vmatprep.subr.bf16.mxu0 %v1952_v47  ;;  %v2495_v47 = vld [vmem:[%s2328_s30 + $0x70] sm:$0xff] }
  0x92   : > { %3112 = vst [vmem:[#allocation35_spill] sm:$0xff] %v2559_v9 }
  0x93   : > { %1626 = vmatpush3.bf16.msra.mxu1 %v1953_v52  ;;  %1738 = vmatpush3.bf16.msra.mxu0 %v1953_v52  ;;  %v267_v52 = vld [vmem:[%s2328_s30 + $0x170] sm:$0xff] }
  0x94   : > { %1627 = vmatprep.subr.bf16.mxu1 %v1954_v58  ;;  %1739 = vmatprep.subr.bf16.mxu0 %v1954_v58  ;;  %v424_v58 = vunpack.c.h.bf16 %v2432_v63 }
  0x96   : > { %678 = vmatmul.mubr.bf16.gmra.mrb[4].mxu0 %v2422_v60  ;;  %742 = vmatmul.mubr.bf16.gmra.mrb[4].mxu1 %v2424_v61  ;;  %v2520_v25 = vsub.f32 %v2416_v57, %v424_v58  ;;  %v426_v58 = vunpack.c.l.bf16 %v2484_v31  ;;  %v2671_v61 = vld [vmem:[%s2328_s30 + $0xe8] sm:$0xff] }
  0x97   : > { %685 = vmatprep.mubr.bf16.mxu0 %v2428_v62  ;;  %749 = vmatprep.mubr.bf16.mxu1 %v2432_v63 }
  0x98   : > { %1628 = vmatpush3.bf16.msra.mxu1 %v1955_v3  ;;  %1740 = vmatpush3.bf16.msra.mxu0 %v1955_v3  ;;  %v272_v3 = vld [vmem:[%s2328_s30 + $0x198] sm:$0xff]  ;;  %3105 = vst [vmem:[#allocation28_spill] sm:$0xff] %v2520_v25  ;;  %v2548_v57 = vsub.f32 %v2463_v15, %v426_v58  ;;  %v2566_v15 = vld [vmem:[%s2328_s30 + $0x90] sm:$0xff]  ;;  %v2569_v58 = vld [vmem:[%s2328_s30 + $0xa8] sm:$0xff] }
  0x99   : > { %1629 = vmatprep.subr.bf16.mxu1 %v1956_v8  ;;  %1741 = vmatprep.subr.bf16.mxu0 %v1956_v8  ;;  %v2514_v8 = vsub.f32 %v2413_v56, %v422_v34  ;;  %v2524_v56 = vpack.c.bf16 %v2495_v47, %v2492_v41  ;;  %v2526_v34 = vpack.c.bf16 %v267_v52, %v265_v48 }
  0x9a   : > { %v2536_v20 = vpack.c.bf16 %v272_v3, %v270_v1  ;;  %3110 = vst [vmem:[#allocation33_spill] sm:$0xff] %v2548_v57 }
  0x9b   : > { %3104 = vst [vmem:[#allocation27_spill] sm:$0xff] %v2514_v8  ;;  %3106 = vst [vmem:[#allocation29_spill] sm:$0xff] %v2526_v34 }
  0x9c   : > { %1630 = vmatpush3.bf16.msra.mxu1 %v1957_v18  ;;  %1742 = vmatpush3.bf16.msra.mxu0 %v1957_v18  ;;  %v423_v18 = vunpack.c.h.bf16 %v2476_v29  ;;  %3109 = vst [vmem:[#allocation32_spill] sm:$0xff] %v2536_v20  ;;  %v430_v8 = vunpack.c.l.bf16 %v2536_v20  ;;  %v432_v25 = vunpack.c.h.bf16 %v2536_v20 }
  0x9d   : > { %1631 = vmatprep.subr.bf16.mxu1 %v1958_v23  ;;  %1743 = vmatprep.subr.bf16.mxu0 %v1958_v23  ;;  %v1962_v23 = vld [vmem:[#allocation5 + $0x70] sm:$0xff]  }
  0x9e   : > { %686 = vmatmul.mubr.bf16.gmra.mrb[8].mxu0 %v2474_v26  ;;  %750 = vmatmul.mubr.bf16.gmra.mrb[8].mxu1 %v2476_v29  ;;  %v2530_v51 = vsub.f32 %v263_v7, %v423_v18  ;;  %v425_v18 = vunpack.c.l.bf16 %v2526_v34  ;;  %v1964_v29 = vld [vmem:[#allocation5 + $0x78] sm:$0xff]   ;;  %v2554_v7 = vld [vmem:[%s2328_s30 + $0x80] sm:$0xff] }
  0x9f   : > { %693 = vmatprep.mubr.bf16.mxu0 %v2480_v30  ;;  %757 = vmatprep.mubr.bf16.mxu1 %v2484_v31 }
  0xa0   : > { %1632 = vmatpush3.bf16.msra.mxu1 %v1959_v35  ;;  %1744 = vmatpush3.bf16.msra.mxu0 %v1959_v35  ;;  %3108 = vst [vmem:[#allocation31_spill] sm:$0xff] %v2530_v51  ;;  %v2534_v35 = vpack.c.bf16 %v2506_v50, %v2503_v49  ;;  %v2572_v51 = vld [vmem:[%s2328_s30 + $0xb8] sm:$0xff] }
  0xa1   : > { %1633 = vmatprep.subr.bf16.mxu1 %v1960_v55  ;;  %1745 = vmatprep.subr.bf16.mxu0 %v1960_v55  ;;  %v269_v55 = vld [vmem:[%s2328_s30 + $0x180] sm:$0xff] }
  0xa2   : > { %v2556_v31 = vpack.c.bf16 %v271_v24, %v269_v55 }
  0xa4   : > { %1634 = vmatpush3.bf16.msra.mxu1 %v1961_v19  ;;  %1746 = vmatpush3.bf16.msra.mxu0 %v1961_v19  ;;  %v427_v19 = vunpack.c.h.bf16 %v2526_v34  ;;  %3111 = vst [vmem:[#allocation34_spill] sm:$0xff] %v2556_v31  ;;  %v429_v63 = vunpack.c.l.bf16 %v2556_v31  ;;  %v431_v36 = vunpack.c.h.bf16 %v2556_v31 }
  0xa5   : > { %1635 = vmatprep.subr.bf16.mxu1 %v1962_v23  ;;  %1747 = vmatprep.subr.bf16.mxu0 %v1962_v23  ;;  %v2561_v23 = vsub.f32 %v265_v48, %v425_v18  ;;  %v1965_v48 = vld [vmem:[#allocation5 + $0x38] sm:$0xff]  }
  0xa6   : > { %694 = vmatmul.mubr.bf16.gmra.mrb[12].mxu0 %v2524_v56  ;;  %758 = vmatmul.mubr.bf16.gmra.mrb[12].mxu1 %v2526_v34  ;;  %v2574_v34 = vsub.f32 %v267_v52, %v427_v19  ;;  %v2586_v19 = vsub.f32 %v270_v1, %v430_v8  ;;  %v2594_v37 = vsub.f32 %v269_v55, %v429_v63  ;;  %v273_v1 = vld [vmem:[%s2328_s30 + $0x1a0] sm:$0xff]  ;;  %v2620_v8 = vld [vmem:[%s2328_s30 + $0xb0] sm:$0xff]  ;;  %v2623_v55 = vld [vmem:[%s2328_s30 + $0xc8] sm:$0xff] }
  0xa7   : > { %3113 = vst [vmem:[#allocation36_spill] sm:$0xff] %v2561_v23  ;;  %701 = vmatprep.mubr.bf16.mxu0 %v2534_v35  ;;  %765 = vmatprep.mubr.bf16.mxu1 %v2536_v20  ;;  %v2588_v20 = vsub.f32 %v272_v3, %v432_v25  ;;  %v2596_v18 = vsub.f32 %v271_v24, %v431_v36  ;;  %v275_v25 = vld [vmem:[%s2328_s30 + $0x1b0] sm:$0xff]  ;;  %v2617_v36 = vld [vmem:[%s2328_s30 + $0xa0] sm:$0xff]  ;;  %v2628_v3 = vld [vmem:[%s2328_s30 + $0xd8] sm:$0xff] }
  0xa8   : > { %3114 = vst [vmem:[#allocation37_spill] sm:$0xff] %v2574_v34  ;;  %1636 = vmatpush3.bf16.msra.mxu1 %v1963_v6  ;;  %1748 = vmatpush3.bf16.msra.mxu0 %v1963_v6  ;;  %3115 = vst [vmem:[#allocation38_spill] sm:$0xff] %v2586_v19  ;;  %v2592_v6 = vpack.c.bf16 %v2566_v15, %v2554_v7  ;;  %v2602_v52 = vpack.c.bf16 %v276_v2, %v274_v17 }
  0xa9   : > { %1637 = vmatprep.subr.bf16.mxu1 %v1964_v29  ;;  %1749 = vmatprep.subr.bf16.mxu0 %v1964_v29  ;;  %3116 = vst [vmem:[#allocation39_spill] sm:$0xff] %v2588_v20  ;;  %3117 = vst [vmem:[#allocation40_spill] sm:$0xff] %v2594_v37  ;;  %v2600_v29 = vpack.c.bf16 %v2572_v51, %v2569_v58  ;;  %v2612_v63 = vpack.c.bf16 %v275_v25, %v273_v1  ;;  %v278_v37 = vld [vmem:[%s2328_s30 + $0x1c8] sm:$0xff] }
  0xaa   : > { %3118 = vst [vmem:[#allocation41_spill] sm:$0xff] %v2596_v18  ;;  %3119 = vst [vmem:[#allocation42_spill] sm:$0xff] %v2602_v52  ;;  %v436_v24 = vunpack.c.h.bf16 %v2602_v52  ;;  %v280_v18 = vld [vmem:[%s2328_s30 + $0x1d8] sm:$0xff]  ;;  %v2640_v34 = vpack.c.bf16 %v2620_v8, %v2617_v36  ;;  %v2648_v9 = vpack.c.bf16 %v2628_v3, %v2623_v55 }
  0xab   : > { %3120 = vst [vmem:[#allocation43_spill] sm:$0xff] %v2612_v63  ;;  %v435_v19 = vunpack.c.h.bf16 %v2612_v63 }
  0xac   : > { %1638 = vmatpush3.bf16.msra.mxu1 %v1965_v48  ;;  %1750 = vmatpush3.bf16.msra.mxu0 %v1965_v48  ;;  %v434_v48 = vunpack.c.l.bf16 %v2602_v52  ;;  %v2636_v23 = vsub.f32 %v276_v2, %v436_v24  ;;  %v277_v2 = vld [vmem:[%s2328_s30 + $0x1c0] sm:$0xff]  ;;  %v279_v24 = vld [vmem:[%s2328_s30 + $0x1d0] sm:$0xff] }
  0xad   : > { %v2644_v57 = vsub.f32 %v275_v25, %v435_v19  ;;  %v2660_v19 = vpack.c.bf16 %v279_v24, %v277_v2  ;;  %v2668_v25 = vld [vmem:[%s2328_s30 + $0xd0] sm:$0xff] }
  0xae   : > { %702 = vmatmul.mubr.bf16.gmra.mrb[16].mxu0 %v2592_v6  ;;  %766 = vmatmul.mubr.bf16.gmra.mrb[16].mxu1 %v2556_v31  ;;  %v433_v31 = vunpack.c.l.bf16 %v2612_v63  ;;  %v2634_v20 = vsub.f32 %v274_v17, %v434_v48  ;;  %3122 = vst [vmem:[#allocation45_spill] sm:$0xff] %v2636_v23  ;;  %v2650_v17 = vpack.c.bf16 %v280_v18, %v278_v37 }
  0xaf   : > { %709 = vmatprep.mubr.bf16.mxu0 %v2600_v29  ;;  %773 = vmatprep.mubr.bf16.mxu1 %v2602_v52  ;;  %3124 = vst [vmem:[#allocation47_spill] sm:$0xff] %v2644_v57  ;;  %3126 = vst [vmem:[#allocation49_spill] sm:$0xff] %v2660_v19  ;;  %v282_v57 = vld [vmem:[%s2328_s30 + $0x1e8] sm:$0xff]  ;;  %v439_v23 = vunpack.c.h.bf16 %v2660_v19 }
  0xb0   : > { %3121 = vst [vmem:[#allocation44_spill] sm:$0xff] %v2634_v20  ;;  %v2642_v52 = vsub.f32 %v273_v1, %v433_v31  ;;  %3125 = vst [vmem:[#allocation48_spill] sm:$0xff] %v2650_v17  ;;  %v2665_v1 = vld [vmem:[%s2328_s30 + $0xc0] sm:$0xff]  ;;  %v438_v31 = vunpack.c.l.bf16 %v2650_v17  ;;  %v440_v48 = vunpack.c.h.bf16 %v2650_v17  ;;  %v437_v20 = vunpack.c.l.bf16 %v2660_v19 }
  0xb1   : > { %v2688_v44 = vpack.c.bf16 %v2668_v25, %v2665_v1 }
  0xb2   : > { %3123 = vst [vmem:[#allocation46_spill] sm:$0xff] %v2642_v52  ;;  %v2676_v52 = vld [vmem:[%s2328_s30 + $0xf8] sm:$0xff]  ;;  %v2682_v12 = vsub.f32 %v278_v37, %v438_v31  ;;  %v2684_v13 = vsub.f32 %v280_v18, %v440_v48  ;;  %v2690_v59 = vsub.f32 %v277_v2, %v437_v20  ;;  %v281_v37 = vld [vmem:[%s2328_s30 + $0x1e0] sm:$0xff]  ;;  %v283_v31 = vld [vmem:[%s2328_s30 + $0x1f0] sm:$0xff] }
  0xb3   : > { %3127 = vst [vmem:[#allocation50_spill] sm:$0xff] %v2676_v52  ;;  %v2696_v0 = vpack.c.bf16 %v2676_v52, %v2671_v61  ;;  %v2708_v20 = vpack.c.bf16 %v283_v31, %v281_v37  ;;  %v2716_v2 = vld [vmem:[%s2328_s30 + $0xf0] sm:$0xff]  ;;  %v388_v52 = vunpack.c.h.bf16 %v2386_v43 }
  0xb4   : > { %3128 = vst [vmem:[#allocation51_spill] sm:$0xff] %v2682_v12  ;;  %3129 = vst [vmem:[#allocation52_spill] sm:$0xff] %v2684_v13  ;;  %v383_v13 = vunpack.c.h.bf16 %v2376_v38 }
  0xb5   : > { %3130 = vst [vmem:[#allocation53_spill] sm:$0xff] %v2690_v59  ;;  %v441_v48 = vunpack.c.l.bf16 %v2708_v20  ;;  %v443_v59 = vunpack.c.h.bf16 %v2708_v20 }
  0xb6   : > { %710 = vmatmul.mubr.bf16.gmra.mrb[20].mxu0 %v2640_v34  ;;  %774 = vmatmul.mubr.bf16.gmra.mrb[20].mxu1 %v2612_v63  ;;  %v284_v63 = vld [vmem:[%s2328_s30 + $0x1f8] sm:$0xff] }
  0xb7   : > { %717 = vmatprep.mubr.bf16.mxu0 %v2648_v9  ;;  %781 = vmatprep.mubr.bf16.mxu1 %v2650_v17  ;;  %v2692_v17 = vsub.f32 %v279_v24, %v439_v23  ;;  %v2698_v39 = vpack.c.bf16 %v284_v63, %v282_v57  ;;  %v2713_v23 = vld [vmem:[%s2328_s30 + $0xe0] sm:$0xff]  ;;  %v2732_v42 = vsub.f32 %v281_v37, %v441_v48 }
  0xb8   : > { %v2730_v40 = vpack.c.bf16 %v2716_v2, %v2713_v23  ;;  %v2734_v16 = vsub.f32 %v283_v31, %v443_v59  ;;  %v3133_v59 = vpack.c.bf16 %v2352_v22, %v2350_v21  ;;  %v452_v31 = vsub.f32 %v2368_v33, %v388_v52 }
  0xb9   : > { %3131 = vst [vmem:[#allocation54_spill] sm:$0xff] %v2692_v17  ;;  %3132 = vst [vmem:[#allocation55_spill] sm:$0xff] %v2698_v39  ;;  %v442_v24 = vunpack.c.l.bf16 %v2698_v39  ;;  %v444_v18 = vunpack.c.h.bf16 %v2698_v39  ;;  %v381_v17 = vunpack.c.l.bf16 %v2376_v38  ;;  %v391_v52 = vunpack.c.h.bf16 %v2474_v26 }
  0xbb   : > { %v2725_v12 = vsub.f32 %v284_v63, %v444_v18  ;;  %v445_v18 = vsub.f32 %v2357_v27, %v381_v17  ;;  %v385_v63 = vunpack.c.l.bf16 %v2422_v60  ;;  %v387_v27 = vunpack.c.h.bf16 %v2422_v60 }
  0xbc   : > { %v392_v17 = vunpack.c.h.bf16 %v2428_v62 }
  0xbd   : > { %v451_v21 = vsub.f32 %v2394_v46, %v387_v27  ;;  %v399_v27 = vunpack.c.h.bf16 %v2592_v6 }
  0xbe   : > { %718 = vmatmul.mubr.bf16.gmra.mrb[24].mxu0 %v2688_v44  ;;  %782 = vmatmul.mubr.bf16.gmra.mrb[24].mxu1 %v2660_v19  ;;  %v2723_v19 = vsub.f32 %v282_v57, %v442_v24  ;;  %v447_v24 = vsub.f32 %v2360_v28, %v383_v13  ;;  %v390_v13 = vunpack.c.l.bf16 %v2428_v62 }
  0xbf   : > { %725 = vmatprep.mubr.bf16.mxu0 %v2696_v0  ;;  %789 = vmatprep.mubr.bf16.mxu1 %v2698_v39  ;;  %v386_v39 = vunpack.c.l.bf16 %v2386_v43 }
  0xc0   : > { %v540_v57 = vpack.c.bf16 %v2725_v12, %v2723_v19  ;;  %v509_v48 = vpack.c.bf16 %v447_v24, %v445_v18  ;;  %v454_v22 = vsub.f32 %v2404_v53, %v390_v13  ;;  %v396_v24 = vunpack.c.h.bf16 %v2480_v30 }
  0xc1   : > { %v450_v37 = vsub.f32 %v2365_v32, %v386_v39  ;;  %v456_v32 = vsub.f32 %v2407_v54, %v392_v17  ;;  %v389_v39 = vunpack.c.l.bf16 %v2474_v26  ;;  %v404_v13 = vunpack.c.h.bf16 %v2600_v29 }
  0xc2   : > { %v460_v53 = vsub.f32 %v2456_v11, %v396_v24  ;;  %v401_v17 = vunpack.c.l.bf16 %v2640_v34  ;;  %v411_v24 = vunpack.c.h.bf16 %v2730_v40 }
  0xc3   : > { %v512_v28 = vpack.c.bf16 %v452_v31, %v450_v37  ;;  %v514_v18 = vpack.c.bf16 %v456_v32, %v454_v22  ;;  %v400_v31 = vunpack.c.h.bf16 %v2534_v35  ;;  %v408_v22 = vunpack.c.h.bf16 %v2648_v9 }
  0xc4   : > { %v405_v32 = vunpack.c.l.bf16 %v2688_v44 }
  0xc6   : > { %726 = vmatmul.mubr.bf16.gmra.mrb[28].mxu0 %v2730_v40  ;;  %790 = vmatmul.mubr.bf16.gmra.mrb[28].mxu1 %v2708_v20 }
  0xc7   : > { %926 = vmatprep.mubr.bf16.mxu1 %v2341_v14  ;;  %1087 = vmatprep.mubr.bf16.mxu0 %v3133_v59  ;;  %v449_v14 = vsub.f32 %v2391_v45, %v385_v63  ;;  %v455_v45 = vsub.f32 %v2442_v5, %v391_v52  ;;  %v393_v63 = vunpack.c.l.bf16 %v2524_v56  ;;  %v395_v59 = vunpack.c.h.bf16 %v2524_v56 }
  0xc8   : > { %v412_v52 = vunpack.c.h.bf16 %v2696_v0 }
  0xc9   : > { %v511_v33 = vpack.c.bf16 %v451_v21, %v449_v14  ;;  %v403_v14 = vunpack.c.h.bf16 %v2640_v34 }
  0xce   : > { %927 = vmatmul.mubr.bf16.vlgmr.msra.gmra.mrb[32].mxu1 %v2376_v38  ;;  %1088 = vmatmul.mubr.bf16.vlgmr.msra.gmra.mrb[32].mxu0 %v509_v48  ;;  %v394_v38 = vunpack.c.l.bf16 %v2480_v30  ;;  %v397_v48 = vunpack.c.l.bf16 %v2592_v6 }
  0xcf   : > { %934 = vmatprep.mubr.bf16.mxu1 %v2386_v43  ;;  %1095 = vmatprep.mubr.bf16.mxu0 %v512_v28  ;;  %v453_v43 = vsub.f32 %v2439_v4, %v389_v39  ;;  %v459_v4 = vsub.f32 %v2495_v47, %v395_v59 }
  0xd0   : > { %v458_v46 = vsub.f32 %v2451_v10, %v394_v38  ;;  %v464_v10 = vsub.f32 %v2506_v50, %v400_v31  ;;  %v409_v38 = vunpack.c.l.bf16 %v2730_v40 }
  0xd1   : > { %v513_v54 = vpack.c.bf16 %v455_v45, %v453_v43  ;;  %v3137_v45 = vld [vmem:[#allocation14_spill] sm:$0xff] }
  0xd2   : > { %v516_v37 = vpack.c.bf16 %v460_v53, %v458_v46  ;;  %v3139_v53 = vld [vmem:[#allocation13_spill] sm:$0xff] }
  0xd6   : > { %935 = vmatmul.mubr.bf16.gmra.mrb[36].mxu1 %v2422_v60  ;;  %1096 = vmatmul.mubr.bf16.gmra.mrb[36].mxu0 %v511_v33  ;;  %v398_v60 = vunpack.c.l.bf16 %v2534_v35  ;;  %v407_v33 = vunpack.c.h.bf16 %v2688_v44 }
  0xd7   : > { %942 = vmatprep.mubr.bf16.mxu1 %v2428_v62  ;;  %1103 = vmatprep.mubr.bf16.mxu0 %v514_v18  ;;  %v457_v62 = vsub.f32 %v2492_v41, %v393_v63  ;;  %v463_v41 = vsub.f32 %v2566_v15, %v399_v27  ;;  %v472_v15 = vsub.f32 %v2628_v3, %v408_v22  ;;  %v3145_v63 = vld [vmem:[#allocation21_spill] sm:$0xff]  ;;  %v3157_v27 = vld [vmem:[#allocation30_spill] sm:$0xff] }
  0xd8   : > { %v462_v5 = vsub.f32 %v2503_v49, %v398_v60  ;;  %v468_v49 = vsub.f32 %v2572_v51, %v404_v13  ;;  %v3149_v60 = vld [vmem:[#allocation25_spill] sm:$0xff]  ;;  %v3160_v13 = vld [vmem:[#allocation35_spill] sm:$0xff] }
  0xd9   : > { %v515_v11 = vpack.c.bf16 %v459_v4, %v457_v62  ;;  %v3151_v62 = vld [vmem:[#allocation19_spill] sm:$0xff]  ;;  %v3152_v4 = vld [vmem:[#allocation28_spill] sm:$0xff] }
  0xda   : > { %v518_v28 = vpack.c.bf16 %v464_v10, %v462_v5  ;;  %v3153_v5 = vld [vmem:[#allocation27_spill] sm:$0xff] }
  0xdb   : > { %v3154_v10 = vpack.c.bf16 %v3152_v4, %v3153_v5 }
  0xde   : > { %943 = vmatmul.mubr.bf16.gmra.mrb[40].mxu1 %v2474_v26  ;;  %1104 = vmatmul.mubr.bf16.gmra.mrb[40].mxu0 %v513_v54  ;;  %v402_v26 = vunpack.c.l.bf16 %v2600_v29  ;;  %v3141_v54 = vld [vmem:[#allocation17_spill] sm:$0xff] }
  0xdf   : > { %950 = vmatprep.mubr.bf16.mxu1 %v2480_v30  ;;  %1111 = vmatprep.mubr.bf16.mxu0 %v516_v37  ;;  %v461_v30 = vsub.f32 %v2554_v7, %v397_v48  ;;  %v467_v7 = vsub.f32 %v2620_v8, %v403_v14  ;;  %v3134_v8 = vld [vmem:[#allocation50_spill] sm:$0xff]  ;;  %v3156_v48 = vld [vmem:[#allocation31_spill] sm:$0xff]  ;;  %v3167_v14 = vld [vmem:[#allocation32_spill] sm:$0xff] }
  0xe0   : > { %v466_v47 = vsub.f32 %v2569_v58, %v402_v26  ;;  %v3148_v37 = vld [vmem:[#allocation26_spill] sm:$0xff]  ;;  %v3159_v26 = vld [vmem:[#allocation24_spill] sm:$0xff] }
  0xe1   : > { %v517_v50 = vpack.c.bf16 %v463_v41, %v461_v30  ;;  %v3150_v31 = vpack.c.bf16 %v3148_v37, %v3149_v60  ;;  %v3161_v30 = vld [vmem:[#allocation33_spill] sm:$0xff] }
  0xe2   : > { %v520_v21 = vpack.c.bf16 %v468_v49, %v466_v47  ;;  %v3162_v41 = vpack.c.bf16 %v3160_v13, %v3161_v30  ;;  %v3163_v47 = vld [vmem:[#allocation29_spill] sm:$0xff] }
  0xe3   : > { %v3164_v49 = vld [vmem:[#allocation37_spill] sm:$0xff] }
  0xe6   : > { %951 = vmatmul.mubr.bf16.gmra.mrb[44].mxu1 %v2524_v56  ;;  %1112 = vmatmul.mubr.bf16.gmra.mrb[44].mxu0 %v515_v11  ;;  %v406_v56 = vunpack.c.l.bf16 %v2648_v9  ;;  %v3155_v11 = vld [vmem:[#allocation23_spill] sm:$0xff] }
  0xe7   : > { %958 = vmatprep.mubr.bf16.mxu1 %v2534_v35  ;;  %1119 = vmatprep.mubr.bf16.mxu0 %v518_v28  ;;  %v465_v35 = vsub.f32 %v2617_v36, %v401_v17  ;;  %v471_v36 = vsub.f32 %v2668_v25, %v407_v33  ;;  %v3136_v25 = vld [vmem:[#allocation15_spill] sm:$0xff]  ;;  %v3158_v28 = vpack.c.bf16 %v3156_v48, %v3157_v27  ;;  %v3177_v33 = vld [vmem:[#allocation44_spill] sm:$0xff] }
  0xe8   : > { %v470_v51 = vsub.f32 %v2623_v55, %v406_v56  ;;  %v476_v55 = vsub.f32 %v3134_v8, %v412_v52  ;;  %v3138_v46 = vpack.c.bf16 %v3136_v25, %v3137_v45  ;;  %v3169_v56 = vld [vmem:[#allocation38_spill] sm:$0xff]  ;;  %v3180_v52 = vld [vmem:[#allocation47_spill] sm:$0xff]  ;;  %v3184_v8 = vld [vmem:[#allocation52_spill] sm:$0xff] }
  0xe9   : > { %v519_v58 = vpack.c.bf16 %v467_v7, %v465_v35  ;;  %v3171_v35 = vld [vmem:[#allocation34_spill] sm:$0xff]  ;;  %v3172_v7 = vld [vmem:[#allocation41_spill] sm:$0xff] }
  0xea   : > { %v522_v39 = vpack.c.bf16 %v472_v15, %v470_v51  ;;  %v3173_v51 = vld [vmem:[#allocation40_spill] sm:$0xff] }
  0xeb   : > { %v3174_v15 = vpack.c.bf16 %v3172_v7, %v3173_v51 }
  0xee   : > { %959 = vmatmul.mubr.bf16.gmra.mrb[48].mxu1 %v2592_v6  ;;  %1120 = vmatmul.mubr.bf16.gmra.mrb[48].mxu0 %v517_v50  ;;  %v410_v6 = vunpack.c.l.bf16 %v2696_v0  ;;  %v3165_v50 = vld [vmem:[#allocation36_spill] sm:$0xff] }
  0xef   : > { %966 = vmatprep.mubr.bf16.mxu1 %v2600_v29  ;;  %1127 = vmatprep.mubr.bf16.mxu0 %v520_v21  ;;  %v469_v29 = vsub.f32 %v2665_v1, %v405_v32  ;;  %v475_v1 = vsub.f32 %v2716_v2, %v411_v24  ;;  %v3143_v2 = vld [vmem:[#allocation16_spill] sm:$0xff]  ;;  %v3166_v17 = vpack.c.bf16 %v3164_v49, %v3165_v50  ;;  %v3168_v21 = vld [vmem:[#allocation39_spill] sm:$0xff]  ;;  %v3176_v32 = vld [vmem:[#allocation45_spill] sm:$0xff] }
  0xf0   : > { %v474_v3 = vsub.f32 %v2671_v61, %v410_v6  ;;  %v3135_v61 = vld [vmem:[#allocation12_spill] sm:$0xff]  ;;  %v3170_v22 = vpack.c.bf16 %v3168_v21, %v3169_v56  ;;  %v3179_v6 = vld [vmem:[#allocation43_spill] sm:$0xff]  ;;  %v3188_v24 = vld [vmem:[#allocation54_spill] sm:$0xff] }
  0xf1   : > { %v521_v18 = vpack.c.bf16 %v471_v36, %v469_v29  ;;  %v3181_v29 = vld [vmem:[#allocation46_spill] sm:$0xff] }
  0xf2   : > { %v524_v43 = vpack.c.bf16 %v476_v55, %v474_v3  ;;  %v3182_v36 = vpack.c.bf16 %v3180_v52, %v3181_v29  ;;  %v3183_v3 = vld [vmem:[#allocation48_spill] sm:$0xff]  ;;  %v3185_v55 = vld [vmem:[#allocation51_spill] sm:$0xff] }
  0xf6   : > { %967 = vmatmul.mubr.bf16.gmra.mrb[52].mxu1 %v2640_v34  ;;  %1128 = vmatmul.mubr.bf16.gmra.mrb[52].mxu0 %v519_v58  ;;  %v473_v34 = vsub.f32 %v2713_v23, %v409_v38  ;;  %v3175_v58 = vld [vmem:[#allocation42_spill] sm:$0xff]  ;;  %v3187_v38 = vld [vmem:[#allocation49_spill] sm:$0xff] }
  0xf7   : > { %974 = vmatprep.mubr.bf16.mxu1 %v2648_v9  ;;  %1135 = vmatprep.mubr.bf16.mxu0 %v522_v39  ;;  %v3178_v39 = vpack.c.bf16 %v3176_v32, %v3177_v33 }
  0xf8   : > { %v523_v9 = vpack.c.bf16 %v475_v1, %v473_v34  ;;  %v3191_v1 = vld [vmem:[#allocation55_spill] sm:$0xff] }
  0xfe   : > { %975 = vmatmul.mubr.bf16.gmra.mrb[56].mxu1 %v2688_v44  ;;  %1136 = vmatmul.mubr.bf16.gmra.mrb[56].mxu0 %v521_v18  ;;  %v3140_v44 = vld [vmem:[#allocation20_spill] sm:$0xff]  ;;  %v3186_v18 = vpack.c.bf16 %v3184_v8, %v3185_v55 }
  0xff   : > { %982 = vmatprep.mubr.bf16.mxu1 %v2696_v0  ;;  %1143 = vmatprep.mubr.bf16.mxu0 %v524_v43  ;;  %v3142_v23 = vpack.c.bf16 %v3140_v44, %v3141_v54  ;;  %v3144_v0 = vld [vmem:[#allocation22_spill] sm:$0xff]  ;;  %v3189_v43 = vld [vmem:[#allocation53_spill] sm:$0xff] }
 0x100   : > { %v3146_v59 = vpack.c.bf16 %v3144_v0, %v3145_v63  ;;  %v3190_v34 = vpack.c.bf16 %v3188_v24, %v3189_v43 }
 0x106   : > { %983 = vmatmul.mubr.bf16.gmra.mrb[60].mxu1 %v2730_v40  ;;  %1144 = vmatmul.mubr.bf16.gmra.mrb[60].mxu0 %v523_v9  ;;  %v3147_v40 = vld [vmem:[#allocation18_spill] sm:$0xff]  ;;  %v3192_v9 = vpack.c.bf16 %v2734_v16, %v2732_v42 }
 0x107   : > { %990 = vmatprep.mubr.bf16.mxu1 %v3135_v61  ;;  %1151 = vmatprep.mubr.bf16.mxu0 %v3138_v46 }
 0x10e   : > { %991 = vmatmul.mubr.bf16.gmra.mrb[64].mxu1 %v3139_v53  ;;  %1152 = vmatmul.mubr.bf16.gmra.mrb[64].mxu0 %v3142_v23 }
 0x10f   : > { %998 = vmatprep.mubr.bf16.mxu1 %v3143_v2  ;;  %1159 = vmatprep.mubr.bf16.mxu0 %v3146_v59 }
 0x116   : > { %999 = vmatmul.mubr.bf16.gmra.mrb[68].mxu1 %v3147_v40  ;;  %1160 = vmatmul.mubr.bf16.gmra.mrb[68].mxu0 %v3150_v31 }
 0x117   : > { %1006 = vmatprep.mubr.bf16.mxu1 %v3151_v62  ;;  %1167 = vmatprep.mubr.bf16.mxu0 %v3154_v10 }
 0x11e   : > { %1007 = vmatmul.mubr.bf16.gmra.mrb[72].mxu1 %v3155_v11  ;;  %1168 = vmatmul.mubr.bf16.gmra.mrb[72].mxu0 %v3158_v28 }
 0x11f   : > { %1014 = vmatprep.mubr.bf16.mxu1 %v3159_v26  ;;  %1175 = vmatprep.mubr.bf16.mxu0 %v3162_v41 }
 0x126   : > { %1015 = vmatmul.mubr.bf16.gmra.mrb[76].mxu1 %v3163_v47  ;;  %1176 = vmatmul.mubr.bf16.gmra.mrb[76].mxu0 %v3166_v17 }
 0x127   : > { %1022 = vmatprep.mubr.bf16.mxu1 %v3167_v14  ;;  %1183 = vmatprep.mubr.bf16.mxu0 %v3170_v22 }
 0x12e   : > { %1023 = vmatmul.mubr.bf16.gmra.mrb[80].mxu1 %v3171_v35  ;;  %1184 = vmatmul.mubr.bf16.gmra.mrb[80].mxu0 %v3174_v15 }
 0x12f   : > { %1030 = vmatprep.mubr.bf16.mxu1 %v3175_v58  ;;  %1191 = vmatprep.mubr.bf16.mxu0 %v3178_v39 }
 0x136   : > { %1031 = vmatmul.mubr.bf16.gmra.mrb[84].mxu1 %v3179_v6  ;;  %1192 = vmatmul.mubr.bf16.gmra.mrb[84].mxu0 %v3182_v36 }
 0x137   : > { %1038 = vmatprep.mubr.bf16.mxu1 %v3183_v3  ;;  %1199 = vmatprep.mubr.bf16.mxu0 %v3186_v18 }
 0x13e   : > { %1039 = vmatmul.mubr.bf16.gmra.mrb[88].mxu1 %v3187_v38  ;;  %1200 = vmatmul.mubr.bf16.gmra.mrb[88].mxu0 %v3190_v34 }
 0x13f   : > { %1046 = vmatprep.mubr.bf16.mxu1 %v3191_v1  ;;  %1207 = vmatprep.mubr.bf16.mxu0 %v540_v57 }
 0x146   : > { %1047 = vmatmul.mubr.bf16.gmra.mrb[92].mxu1 %v2708_v20  ;;  %1208 = vmatmul.mubr.bf16.gmra.mrb[92].mxu0 %v3192_v9 }
 0x161   : > { %v1527_v61 = vpop.f32.mrb[0].mxu0  ;;  %v1575_v25 = vpop.f32.mrb[0].mxu1 }
 0x162   : > { %v1528_v45 = vpop.f32.mrb[1].mxu0  ;;  %v1576_v46 = vpop.f32.mrb[1].mxu1 }
 0x163   : > { %v2883_v53 = vadd.f32 %v1528_v45, %v1527_v61  ;;  %v2885_v44 = vadd.f32 %v1576_v46, %v1575_v25  ;;  %v1530_v54 = vpop.f32.mrb[2].mxu0  ;;  %v1578_v23 = vpop.f32.mrb[2].mxu1 }
 0x164   : > { %v1531_v2 = vpop.f32.mrb[3].mxu0  ;;  %v1579_v0 = vpop.f32.mrb[3].mxu1 }
 0x165   : > { %v2887_v12 = vadd.f32 %v1531_v2, %v1530_v54  ;;  %v2889_v19 = vadd.f32 %v1579_v0, %v1578_v23 }
 0x169   : > { %v1533_v20 = vpop.f32.mrb[4].mxu0  ;;  %v1581_v57 = vpop.f32.mrb[4].mxu1 }
 0x16a   : > { %v1534_v16 = vpop.f32.mrb[5].mxu0  ;;  %v1582_v42 = vpop.f32.mrb[5].mxu1 }
 0x16b   : > { %v2891_v63 = vadd.f32 %v1534_v16, %v1533_v20  ;;  %v2893_v59 = vadd.f32 %v1582_v42, %v1581_v57  ;;  %v1536_v40 = vpop.f32.mrb[6].mxu0  ;;  %v1584_v37 = vpop.f32.mrb[6].mxu1 }
 0x16c   : > { %v1537_v60 = vpop.f32.mrb[7].mxu0  ;;  %v1585_v31 = vpop.f32.mrb[7].mxu1 }
 0x16d   : > { %v2895_v62 = vadd.f32 %v1537_v60, %v1536_v40  ;;  %v2897_v4 = vadd.f32 %v1585_v31, %v1584_v37 }
 0x171   : > { %v1539_v5 = vpop.f32.mrb[8].mxu0  ;;  %v1587_v10 = vpop.f32.mrb[8].mxu1 }
 0x172   : > { %v1540_v11 = vpop.f32.mrb[9].mxu0  ;;  %v1588_v48 = vpop.f32.mrb[9].mxu1 }
 0x173   : > { %v2899_v27 = vadd.f32 %v1540_v11, %v1539_v5  ;;  %v2901_v28 = vadd.f32 %v1588_v48, %v1587_v10  ;;  %v1542_v26 = vpop.f32.mrb[10].mxu0  ;;  %v1590_v13 = vpop.f32.mrb[10].mxu1 }
 0x174   : > { %v1543_v30 = vpop.f32.mrb[11].mxu0  ;;  %v1591_v41 = vpop.f32.mrb[11].mxu1 }
 0x175   : > { %v2903_v47 = vadd.f32 %v1543_v30, %v1542_v26  ;;  %v2905_v49 = vadd.f32 %v1591_v41, %v1590_v13 }
 0x179   : > { %v1545_v50 = vpop.f32.mrb[12].mxu0  ;;  %v1593_v17 = vpop.f32.mrb[12].mxu1 }
 0x17a   : > { %v1546_v14 = vpop.f32.mrb[13].mxu0  ;;  %v1594_v21 = vpop.f32.mrb[13].mxu1 }
 0x17b   : > { %v2907_v56 = vadd.f32 %v1546_v14, %v1545_v50  ;;  %v2909_v22 = vadd.f32 %v1594_v21, %v1593_v17  ;;  %v1548_v35 = vpop.f32.mrb[14].mxu0  ;;  %v1596_v7 = vpop.f32.mrb[14].mxu1 }
 0x17c   : > { %v1549_v51 = vpop.f32.mrb[15].mxu0  ;;  %v1597_v15 = vpop.f32.mrb[15].mxu1 }
 0x17d   : > { %v2911_v58 = vadd.f32 %v1549_v51, %v1548_v35  ;;  %v2913_v32 = vadd.f32 %v1597_v15, %v1596_v7 }
 0x181   : > { %v1551_v33 = vpop.f32.mrb[16].mxu0  ;;  %v1599_v39 = vpop.f32.mrb[16].mxu1 }
 0x182   : > { %v1552_v6 = vpop.f32.mrb[17].mxu0  ;;  %v1600_v52 = vpop.f32.mrb[17].mxu1 }
 0x183   : > { %v2915_v29 = vadd.f32 %v1552_v6, %v1551_v33  ;;  %v2917_v36 = vadd.f32 %v1600_v52, %v1599_v39  ;;  %v1554_v3 = vpop.f32.mrb[18].mxu0  ;;  %v1602_v8 = vpop.f32.mrb[18].mxu1 }
 0x184   : > { %v1555_v55 = vpop.f32.mrb[19].mxu0  ;;  %v1603_v18 = vpop.f32.mrb[19].mxu1 }
 0x185   : > { %v2919_v38 = vadd.f32 %v1555_v55, %v1554_v3  ;;  %v2921_v24 = vadd.f32 %v1603_v18, %v1602_v8 }
 0x189   : > { %v1557_v43 = vpop.f32.mrb[20].mxu0  ;;  %v1605_v34 = vpop.f32.mrb[20].mxu1 }
 0x18a   : > { %v1558_v1 = vpop.f32.mrb[21].mxu0  ;;  %v1606_v9 = vpop.f32.mrb[21].mxu1 }
 0x18b   : > { %v2923_v61 = vadd.f32 %v1558_v1, %v1557_v43  ;;  %v2925_v25 = vadd.f32 %v1606_v9, %v1605_v34  ;;  %v1560_v45 = vpop.f32.mrb[22].mxu0  ;;  %v1608_v46 = vpop.f32.mrb[22].mxu1 }
 0x18c   : > { %v1561_v54 = vpop.f32.mrb[23].mxu0  ;;  %v1609_v23 = vpop.f32.mrb[23].mxu1 }
 0x18d   : > { %v2927_v2 = vadd.f32 %v1561_v54, %v1560_v45  ;;  %v2929_v0 = vadd.f32 %v1609_v23, %v1608_v46 }
 0x191   : > { %v1563_v20 = vpop.f32.mrb[24].mxu0  ;;  %v1611_v57 = vpop.f32.mrb[24].mxu1 }
 0x192   : > { %v1564_v16 = vpop.f32.mrb[25].mxu0  ;;  %v1612_v42 = vpop.f32.mrb[25].mxu1 }
 0x193   : > { %v2931_v40 = vadd.f32 %v1564_v16, %v1563_v20  ;;  %v2933_v37 = vadd.f32 %v1612_v42, %v1611_v57  ;;  %v1566_v60 = vpop.f32.mrb[26].mxu0  ;;  %v1614_v31 = vpop.f32.mrb[26].mxu1 }
 0x194   : > { %v1567_v5 = vpop.f32.mrb[27].mxu0  ;;  %v1615_v10 = vpop.f32.mrb[27].mxu1 }
 0x195   : > { %v2935_v11 = vadd.f32 %v1567_v5, %v1566_v60  ;;  %v2937_v48 = vadd.f32 %v1615_v10, %v1614_v31 }
 0x199   : > { %v1569_v26 = vpop.f32.mrb[28].mxu0  ;;  %v1617_v13 = vpop.f32.mrb[28].mxu1 }
 0x19a   : > { %v1570_v30 = vpop.f32.mrb[29].mxu0  ;;  %v1618_v41 = vpop.f32.mrb[29].mxu1 }
 0x19b   : > { %v2939_v50 = vadd.f32 %v1570_v30, %v1569_v26  ;;  %v2941_v17 = vadd.f32 %v1618_v41, %v1617_v13  ;;  %v1572_v14 = vpop.f32.mrb[30].mxu0  ;;  %v1620_v21 = vpop.f32.mrb[30].mxu1 }
 0x19c   : > { %v1573_v35 = vpop.f32.mrb[31].mxu0  ;;  %v1621_v7 = vpop.f32.mrb[31].mxu1 }
 0x19d   : > { %v2943_v51 = vadd.f32 %v1573_v35, %v1572_v14  ;;  %v2945_v15 = vadd.f32 %v1621_v7, %v1620_v21 }
 0x1a1   : > { %v1639_v33 = vpop.f32.mrb[32].mxu1  ;;  %v1751_v39 = vpop.f32.mrb[32].mxu0 }
 0x1a2   : > { %v1640_v6 = vpop.f32.mrb[33].mxu1  ;;  %v1752_v52 = vpop.f32.mrb[33].mxu0 }
 0x1a3   : > { %v1641_v3 = vadd.f32 %v1640_v6, %v1639_v33  ;;  %v1753_v8 = vadd.f32 %v1752_v52, %v1751_v39  ;;  %v1642_v55 = vpop.f32.mrb[34].mxu1  ;;  %v1754_v18 = vpop.f32.mrb[34].mxu0 }
 0x1a4   : > { %v1643_v43 = vpop.f32.mrb[35].mxu1  ;;  %v1755_v34 = vpop.f32.mrb[35].mxu0 }
 0x1a5   : > { %v929_v1 = vadd.f32 %v1641_v3, %v2883_v53  ;;  %v1644_v9 = vadd.f32 %v1643_v43, %v1642_v55  ;;  %v1756_v45 = vadd.f32 %v1755_v34, %v1754_v18 }
 0x1a7   : > { %v1216_v46 = vadd.f32 %v1753_v8, %v929_v1  ;;  %v932_v54 = vadd.f32 %v1644_v9, %v2887_v12 }
 0x1a9   : > { %v1217_v23 = vadd.f32 %v1756_v45, %v932_v54  ;;  %v1645_v20 = vpop.f32.mrb[36].mxu1  ;;  %v1757_v57 = vpop.f32.mrb[36].mxu0  ;;  %v1286_v16 = vmul.f32 %v1216_v46, %v1216_v46 }
 0x1aa   : > { %v1646_v42 = vpop.f32.mrb[37].mxu1  ;;  %v1758_v60 = vpop.f32.mrb[37].mxu0 }
 0x1ab   : > { %v1248_v31 = vadd.f32 %v1217_v23, %v1216_v46  ;;  %v1287_v5 = vmul.f32 %v1217_v23, %v1217_v23  ;;  %v1647_v10 = vadd.f32 %v1646_v42, %v1645_v20  ;;  %v1759_v26 = vadd.f32 %v1758_v60, %v1757_v57  ;;  %v1648_v13 = vpop.f32.mrb[38].mxu1  ;;  %v1760_v30 = vpop.f32.mrb[38].mxu0 }
 0x1ac   : > { %v1649_v41 = vpop.f32.mrb[39].mxu1  ;;  %v1761_v14 = vpop.f32.mrb[39].mxu0 }
 0x1ad   : > { %v1318_v53 = vadd.f32 %v1287_v5, %v1286_v16  ;;  %v937_v21 = vadd.f32 %v1647_v10, %v2891_v63  ;;  %v1650_v35 = vadd.f32 %v1649_v41, %v1648_v13  ;;  %v1762_v7 = vadd.f32 %v1761_v14, %v1760_v30 }
 0x1af   : > { %v1218_v12 = vadd.f32 %v1759_v26, %v937_v21  ;;  %v940_v33 = vadd.f32 %v1650_v35, %v2895_v62 }
 0x1b1   : > { %v1249_v39 = vadd.f32 %v1248_v31, %v1218_v12  ;;  %v1288_v6 = vmul.f32 %v1218_v12, %v1218_v12  ;;  %v1219_v52 = vadd.f32 %v1762_v7, %v940_v33  ;;  %v1651_v3 = vpop.f32.mrb[40].mxu1  ;;  %v1763_v8 = vpop.f32.mrb[40].mxu0 }
 0x1b2   : > { %v1652_v55 = vpop.f32.mrb[41].mxu1  ;;  %v1764_v18 = vpop.f32.mrb[41].mxu0 }
 0x1b3   : > { %v1319_v43 = vadd.f32 %v1318_v53, %v1288_v6  ;;  %v1250_v34 = vadd.f32 %v1249_v39, %v1219_v52  ;;  %v1289_v1 = vmul.f32 %v1219_v52, %v1219_v52  ;;  %v1653_v9 = vadd.f32 %v1652_v55, %v1651_v3  ;;  %v1654_v45 = vpop.f32.mrb[42].mxu1  ;;  %v1766_v46 = vpop.f32.mrb[42].mxu0 }
 0x1b4   : > { %v1765_v54 = vadd.f32 %v1764_v18, %v1763_v8  ;;  %v1655_v63 = vpop.f32.mrb[43].mxu1  ;;  %v1767_v23 = vpop.f32.mrb[43].mxu0 }
 0x1b5   : > { %v1320_v20 = vadd.f32 %v1319_v43, %v1289_v1  ;;  %v945_v57 = vadd.f32 %v1653_v9, %v2899_v27  ;;  %v1656_v62 = vadd.f32 %v1655_v63, %v1654_v45  ;;  %v1768_v16 = vadd.f32 %v1767_v23, %v1766_v46 }
 0x1b7   : > { %v1220_v42 = vadd.f32 %v1765_v54, %v945_v57  ;;  %v948_v60 = vadd.f32 %v1656_v62, %v2903_v47 }
 0x1b9   : > { %v1251_v31 = vadd.f32 %v1250_v34, %v1220_v42  ;;  %v1290_v5 = vmul.f32 %v1220_v42, %v1220_v42  ;;  %v1221_v10 = vadd.f32 %v1768_v16, %v948_v60  ;;  %v1657_v26 = vpop.f32.mrb[44].mxu1  ;;  %v1769_v13 = vpop.f32.mrb[44].mxu0 }
 0x1ba   : > { %v1658_v30 = vpop.f32.mrb[45].mxu1  ;;  %v1770_v41 = vpop.f32.mrb[45].mxu0 }
 0x1bb   : > { %v1321_v14 = vadd.f32 %v1320_v20, %v1290_v5  ;;  %v1252_v53 = vadd.f32 %v1251_v31, %v1221_v10  ;;  %v1291_v21 = vmul.f32 %v1221_v10, %v1221_v10  ;;  %v1659_v35 = vadd.f32 %v1658_v30, %v1657_v26  ;;  %v1660_v7 = vpop.f32.mrb[46].mxu1  ;;  %v1772_v12 = vpop.f32.mrb[46].mxu0 }
 0x1bc   : > { %v1771_v33 = vadd.f32 %v1770_v41, %v1769_v13  ;;  %v1661_v27 = vpop.f32.mrb[47].mxu1  ;;  %v1773_v39 = vpop.f32.mrb[47].mxu0 }
 0x1bd   : > { %v1322_v6 = vadd.f32 %v1321_v14, %v1291_v21  ;;  %v953_v52 = vadd.f32 %v1659_v35, %v2907_v56  ;;  %v1662_v47 = vadd.f32 %v1661_v27, %v1660_v7  ;;  %v1774_v3 = vadd.f32 %v1773_v39, %v1772_v12 }
 0x1bf   : > { %v1222_v8 = vadd.f32 %v1771_v33, %v953_v52  ;;  %v956_v55 = vadd.f32 %v1662_v47, %v2911_v58 }
 0x1c1   : > { %v1253_v18 = vadd.f32 %v1252_v53, %v1222_v8  ;;  %v1292_v43 = vmul.f32 %v1222_v8, %v1222_v8  ;;  %v1223_v34 = vadd.f32 %v1774_v3, %v956_v55  ;;  %v1663_v1 = vpop.f32.mrb[48].mxu1  ;;  %v1775_v9 = vpop.f32.mrb[48].mxu0 }
 0x1c2   : > { %v1664_v45 = vpop.f32.mrb[49].mxu1  ;;  %v1776_v46 = vpop.f32.mrb[49].mxu0 }
 0x1c3   : > { %v1323_v54 = vadd.f32 %v1322_v6, %v1292_v43  ;;  %v1254_v63 = vadd.f32 %v1253_v18, %v1223_v34  ;;  %v1293_v23 = vmul.f32 %v1223_v34, %v1223_v34  ;;  %v1665_v20 = vadd.f32 %v1664_v45, %v1663_v1  ;;  %v1666_v57 = vpop.f32.mrb[50].mxu1  ;;  %v1778_v62 = vpop.f32.mrb[50].mxu0 }
 0x1c4   : > { %v1777_v16 = vadd.f32 %v1776_v46, %v1775_v9  ;;  %v1667_v56 = vpop.f32.mrb[51].mxu1  ;;  %v1779_v42 = vpop.f32.mrb[51].mxu0 }
 0x1c5   : > { %v1324_v60 = vadd.f32 %v1323_v54, %v1293_v23  ;;  %v961_v31 = vadd.f32 %v1665_v20, %v2915_v29  ;;  %v1668_v58 = vadd.f32 %v1667_v56, %v1666_v57  ;;  %v1780_v5 = vadd.f32 %v1779_v42, %v1778_v62 }
 0x1c7   : > { %v1224_v10 = vadd.f32 %v1777_v16, %v961_v31  ;;  %v964_v26 = vadd.f32 %v1668_v58, %v2919_v38 }
 0x1c9   : > { %v1255_v13 = vadd.f32 %v1254_v63, %v1224_v10  ;;  %v1294_v30 = vmul.f32 %v1224_v10, %v1224_v10  ;;  %v1225_v41 = vadd.f32 %v1780_v5, %v964_v26  ;;  %v1669_v14 = vpop.f32.mrb[52].mxu1  ;;  %v1781_v53 = vpop.f32.mrb[52].mxu0 }
 0x1ca   : > { %v1670_v21 = vpop.f32.mrb[53].mxu1  ;;  %v1782_v35 = vpop.f32.mrb[53].mxu0 }
 0x1cb   : > { %v1325_v7 = vadd.f32 %v1324_v60, %v1294_v30  ;;  %v1256_v12 = vadd.f32 %v1255_v13, %v1225_v41  ;;  %v1295_v33 = vmul.f32 %v1225_v41, %v1225_v41  ;;  %v1671_v27 = vadd.f32 %v1670_v21, %v1669_v14  ;;  %v1672_v39 = vpop.f32.mrb[54].mxu1  ;;  %v1784_v6 = vpop.f32.mrb[54].mxu0 }
 0x1cc   : > { %v1783_v52 = vadd.f32 %v1782_v35, %v1781_v53  ;;  %v1673_v29 = vpop.f32.mrb[55].mxu1  ;;  %v1785_v47 = vpop.f32.mrb[55].mxu0 }
 0x1cd   : > { %v1326_v3 = vadd.f32 %v1325_v7, %v1295_v33  ;;  %v969_v8 = vadd.f32 %v1671_v27, %v2923_v61  ;;  %v1674_v38 = vadd.f32 %v1673_v29, %v1672_v39  ;;  %v1786_v55 = vadd.f32 %v1785_v47, %v1784_v6 }
 0x1cf   : > { %v1226_v18 = vadd.f32 %v1783_v52, %v969_v8  ;;  %v972_v43 = vadd.f32 %v1674_v38, %v2927_v2 }
 0x1d1   : > { %v1257_v34 = vadd.f32 %v1256_v12, %v1226_v18  ;;  %v1296_v1 = vmul.f32 %v1226_v18, %v1226_v18  ;;  %v1227_v9 = vadd.f32 %v1786_v55, %v972_v43  ;;  %v1675_v45 = vpop.f32.mrb[56].mxu1  ;;  %v1787_v46 = vpop.f32.mrb[56].mxu0 }
 0x1d2   : > { %v1676_v54 = vpop.f32.mrb[57].mxu1  ;;  %v1788_v63 = vpop.f32.mrb[57].mxu0 }
 0x1d3   : > { %v1327_v23 = vadd.f32 %v1326_v3, %v1296_v1  ;;  %v1258_v20 = vadd.f32 %v1257_v34, %v1227_v9  ;;  %v1297_v57 = vmul.f32 %v1227_v9, %v1227_v9  ;;  %v1677_v62 = vadd.f32 %v1676_v54, %v1675_v45  ;;  %v1678_v16 = vpop.f32.mrb[58].mxu1  ;;  %v1790_v56 = vpop.f32.mrb[58].mxu0 }
 0x1d4   : > { %v1789_v42 = vadd.f32 %v1788_v63, %v1787_v46  ;;  %v1679_v61 = vpop.f32.mrb[59].mxu1  ;;  %v1791_v60 = vpop.f32.mrb[59].mxu0 }
 0x1d5   : > { %v1328_v31 = vadd.f32 %v1327_v23, %v1297_v57  ;;  %v977_v58 = vadd.f32 %v1677_v62, %v2931_v40  ;;  %v1680_v2 = vadd.f32 %v1679_v61, %v1678_v16  ;;  %v1792_v5 = vadd.f32 %v1791_v60, %v1790_v56 }
 0x1d7   : > { %v1228_v10 = vadd.f32 %v1789_v42, %v977_v58  ;;  %v980_v26 = vadd.f32 %v1680_v2, %v2935_v11 }
 0x1d9   : > { %v1259_v13 = vadd.f32 %v1258_v20, %v1228_v10  ;;  %v1298_v30 = vmul.f32 %v1228_v10, %v1228_v10  ;;  %v1229_v41 = vadd.f32 %v1792_v5, %v980_v26  ;;  %v1681_v14 = vpop.f32.mrb[60].mxu1  ;;  %v1793_v53 = vpop.f32.mrb[60].mxu0 }
 0x1da   : > { %v1682_v21 = vpop.f32.mrb[61].mxu1  ;;  %v1794_v35 = vpop.f32.mrb[61].mxu0 }
 0x1db   : > { %v1329_v7 = vadd.f32 %v1328_v31, %v1298_v30  ;;  %v1260_v12 = vadd.f32 %v1259_v13, %v1229_v41  ;;  %v1299_v33 = vmul.f32 %v1229_v41, %v1229_v41  ;;  %v1683_v27 = vadd.f32 %v1682_v21, %v1681_v14  ;;  %v1684_v39 = vpop.f32.mrb[62].mxu1  ;;  %v1796_v6 = vpop.f32.mrb[62].mxu0 }
 0x1dc   : > { %v1795_v52 = vadd.f32 %v1794_v35, %v1793_v53  ;;  %v1685_v40 = vpop.f32.mrb[63].mxu1  ;;  %v1797_v29 = vpop.f32.mrb[63].mxu0 }
 0x1dd   : > { %v1330_v47 = vadd.f32 %v1329_v7, %v1299_v33  ;;  %v985_v3 = vadd.f32 %v1683_v27, %v2939_v50  ;;  %v1686_v11 = vadd.f32 %v1685_v40, %v1684_v39  ;;  %v1798_v8 = vadd.f32 %v1797_v29, %v1796_v6 }
 0x1df   : > { %v1230_v38 = vadd.f32 %v1795_v52, %v985_v3  ;;  %v988_v55 = vadd.f32 %v1686_v11, %v2943_v51 }
 0x1e1   : > { %v1261_v18 = vadd.f32 %v1260_v12, %v1230_v38  ;;  %v1300_v43 = vmul.f32 %v1230_v38, %v1230_v38  ;;  %v1231_v34 = vadd.f32 %v1798_v8, %v988_v55  ;;  %v1687_v1 = vpop.f32.mrb[64].mxu1  ;;  %v1799_v9 = vpop.f32.mrb[64].mxu0 }
 0x1e2   : > { %v1688_v45 = vpop.f32.mrb[65].mxu1  ;;  %v1800_v46 = vpop.f32.mrb[65].mxu0 }
 0x1e3   : > { %v1331_v54 = vadd.f32 %v1330_v47, %v1300_v43  ;;  %v1262_v63 = vadd.f32 %v1261_v18, %v1231_v34  ;;  %v1301_v23 = vmul.f32 %v1231_v34, %v1231_v34  ;;  %v1689_v20 = vadd.f32 %v1688_v45, %v1687_v1  ;;  %v1690_v57 = vpop.f32.mrb[66].mxu1  ;;  %v1802_v62 = vpop.f32.mrb[66].mxu0 }
 0x1e4   : > { %v1801_v16 = vadd.f32 %v1800_v46, %v1799_v9  ;;  %v1691_v50 = vpop.f32.mrb[67].mxu1  ;;  %v1803_v56 = vpop.f32.mrb[67].mxu0 }
 0x1e5   : > { %v1332_v42 = vadd.f32 %v1331_v54, %v1301_v23  ;;  %v993_v61 = vadd.f32 %v1689_v20, %v2885_v44  ;;  %v1692_v51 = vadd.f32 %v1691_v50, %v1690_v57  ;;  %v1804_v60 = vadd.f32 %v1803_v56, %v1802_v62 }
 0x1e7   : > { %v1232_v31 = vadd.f32 %v1801_v16, %v993_v61  ;;  %v996_v58 = vadd.f32 %v1692_v51, %v2889_v19 }
 0x1e9   : > { %v1263_v2 = vadd.f32 %v1262_v63, %v1232_v31  ;;  %v1302_v5 = vmul.f32 %v1232_v31, %v1232_v31  ;;  %v1233_v10 = vadd.f32 %v1804_v60, %v996_v58  ;;  %v1693_v26 = vpop.f32.mrb[68].mxu1  ;;  %v1805_v13 = vpop.f32.mrb[68].mxu0 }
 0x1ea   : > { %v1694_v30 = vpop.f32.mrb[69].mxu1  ;;  %v1806_v41 = vpop.f32.mrb[69].mxu0 }
 0x1eb   : > { %v1333_v14 = vadd.f32 %v1332_v42, %v1302_v5  ;;  %v1264_v53 = vadd.f32 %v1263_v2, %v1233_v10  ;;  %v1303_v21 = vmul.f32 %v1233_v10, %v1233_v10  ;;  %v1695_v35 = vadd.f32 %v1694_v30, %v1693_v26  ;;  %v1696_v7 = vpop.f32.mrb[70].mxu1  ;;  %v1808_v12 = vpop.f32.mrb[70].mxu0 }
 0x1ec   : > { %v1807_v33 = vadd.f32 %v1806_v41, %v1805_v13  ;;  %v1697_v44 = vpop.f32.mrb[71].mxu1  ;;  %v1809_v27 = vpop.f32.mrb[71].mxu0 }
 0x1ed   : > { %v1334_v39 = vadd.f32 %v1333_v14, %v1303_v21  ;;  %v1001_v6 = vadd.f32 %v1695_v35, %v2893_v59  ;;  %v1698_v19 = vadd.f32 %v1697_v44, %v1696_v7  ;;  %v1810_v52 = vadd.f32 %v1809_v27, %v1808_v12 }
 0x1ef   : > { %v1234_v40 = vadd.f32 %v1807_v33, %v1001_v6  ;;  %v1004_v29 = vadd.f32 %v1698_v19, %v2897_v4 }
 0x1f1   : > { %v1265_v47 = vadd.f32 %v1264_v53, %v1234_v40  ;;  %v1304_v3 = vmul.f32 %v1234_v40, %v1234_v40  ;;  %v1235_v11 = vadd.f32 %v1810_v52, %v1004_v29  ;;  %v1699_v8 = vpop.f32.mrb[72].mxu1  ;;  %v1811_v38 = vpop.f32.mrb[72].mxu0 }
 0x1f2   : > { %v1700_v55 = vpop.f32.mrb[73].mxu1  ;;  %v1812_v18 = vpop.f32.mrb[73].mxu0 }
 0x1f3   : > { %v1335_v43 = vadd.f32 %v1334_v39, %v1304_v3  ;;  %v1266_v34 = vadd.f32 %v1265_v47, %v1235_v11  ;;  %v1305_v1 = vmul.f32 %v1235_v11, %v1235_v11  ;;  %v1701_v9 = vadd.f32 %v1700_v55, %v1699_v8  ;;  %v1702_v45 = vpop.f32.mrb[74].mxu1  ;;  %v1814_v46 = vpop.f32.mrb[74].mxu0 }
 0x1f4   : > { %v1813_v54 = vadd.f32 %v1812_v18, %v1811_v38  ;;  %v1703_v59 = vpop.f32.mrb[75].mxu1  ;;  %v1815_v63 = vpop.f32.mrb[75].mxu0 }
 0x1f5   : > { %v1336_v23 = vadd.f32 %v1335_v43, %v1305_v1  ;;  %v1009_v20 = vadd.f32 %v1701_v9, %v2901_v28  ;;  %v1704_v4 = vadd.f32 %v1703_v59, %v1702_v45  ;;  %v1816_v57 = vadd.f32 %v1815_v63, %v1814_v46 }
 0x1f7   : > { %v1236_v62 = vadd.f32 %v1813_v54, %v1009_v20  ;;  %v1012_v16 = vadd.f32 %v1704_v4, %v2905_v49 }
 0x1f9   : > { %v1267_v50 = vadd.f32 %v1266_v34, %v1236_v62  ;;  %v1306_v56 = vmul.f32 %v1236_v62, %v1236_v62  ;;  %v1237_v42 = vadd.f32 %v1816_v57, %v1012_v16  ;;  %v1705_v61 = vpop.f32.mrb[76].mxu1  ;;  %v1817_v51 = vpop.f32.mrb[76].mxu0 }
 0x1fa   : > { %v1706_v60 = vpop.f32.mrb[77].mxu1  ;;  %v1818_v31 = vpop.f32.mrb[77].mxu0 }
 0x1fb   : > { %v1337_v58 = vadd.f32 %v1336_v23, %v1306_v56  ;;  %v1268_v2 = vadd.f32 %v1267_v50, %v1237_v42  ;;  %v1307_v5 = vmul.f32 %v1237_v42, %v1237_v42  ;;  %v1707_v10 = vadd.f32 %v1706_v60, %v1705_v61  ;;  %v1708_v26 = vpop.f32.mrb[78].mxu1  ;;  %v1820_v13 = vpop.f32.mrb[78].mxu0 }
 0x1fc   : > { %v1819_v30 = vadd.f32 %v1818_v31, %v1817_v51  ;;  %v1709_v28 = vpop.f32.mrb[79].mxu1  ;;  %v1821_v41 = vpop.f32.mrb[79].mxu0 }
 0x1fd   : > { %v1338_v14 = vadd.f32 %v1337_v58, %v1307_v5  ;;  %v1017_v53 = vadd.f32 %v1707_v10, %v2909_v22  ;;  %v1710_v49 = vadd.f32 %v1709_v28, %v1708_v26  ;;  %v1822_v21 = vadd.f32 %v1821_v41, %v1820_v13 }
 0x1ff   : > { %v1238_v35 = vadd.f32 %v1819_v30, %v1017_v53  ;;  %v1020_v7 = vadd.f32 %v1710_v49, %v2913_v32 }
 0x201   : > { %v1269_v12 = vadd.f32 %v1268_v2, %v1238_v35  ;;  %v1308_v33 = vmul.f32 %v1238_v35, %v1238_v35  ;;  %v1239_v44 = vadd.f32 %v1822_v21, %v1020_v7  ;;  %v1711_v27 = vpop.f32.mrb[80].mxu1  ;;  %v1823_v39 = vpop.f32.mrb[80].mxu0 }
 0x202   : > { %v1712_v6 = vpop.f32.mrb[81].mxu1  ;;  %v1824_v19 = vpop.f32.mrb[81].mxu0 }
 0x203   : > { %v1339_v52 = vadd.f32 %v1338_v14, %v1308_v33  ;;  %v1270_v40 = vadd.f32 %v1269_v12, %v1239_v44  ;;  %v1309_v29 = vmul.f32 %v1239_v44, %v1239_v44  ;;  %v1713_v47 = vadd.f32 %v1712_v6, %v1711_v27  ;;  %v1714_v3 = vpop.f32.mrb[82].mxu1  ;;  %v1826_v11 = vpop.f32.mrb[82].mxu0 }
 0x204   : > { %v1825_v8 = vadd.f32 %v1824_v19, %v1823_v39  ;;  %v1715_v22 = vpop.f32.mrb[83].mxu1  ;;  %v1827_v38 = vpop.f32.mrb[83].mxu0 }
 0x205   : > { %v1340_v55 = vadd.f32 %v1339_v52, %v1309_v29  ;;  %v1025_v18 = vadd.f32 %v1713_v47, %v2917_v36  ;;  %v1716_v32 = vadd.f32 %v1715_v22, %v1714_v3  ;;  %v1828_v43 = vadd.f32 %v1827_v38, %v1826_v11 }
 0x207   : > { %v1240_v34 = vadd.f32 %v1825_v8, %v1025_v18  ;;  %v1028_v1 = vadd.f32 %v1716_v32, %v2921_v24 }
 0x209   : > { %v1271_v9 = vadd.f32 %v1270_v40, %v1240_v34  ;;  %v1310_v45 = vmul.f32 %v1240_v34, %v1240_v34  ;;  %v1241_v46 = vadd.f32 %v1828_v43, %v1028_v1  ;;  %v1717_v54 = vpop.f32.mrb[84].mxu1  ;;  %v1829_v59 = vpop.f32.mrb[84].mxu0 }
 0x20a   : > { %v1718_v63 = vpop.f32.mrb[85].mxu1  ;;  %v1830_v23 = vpop.f32.mrb[85].mxu0 }
 0x20b   : > { %v1341_v20 = vadd.f32 %v1340_v55, %v1310_v45  ;;  %v1272_v4 = vadd.f32 %v1271_v9, %v1241_v46  ;;  %v1311_v57 = vmul.f32 %v1241_v46, %v1241_v46  ;;  %v1719_v62 = vadd.f32 %v1718_v63, %v1717_v54  ;;  %v1720_v16 = vpop.f32.mrb[86].mxu1  ;;  %v1832_v50 = vpop.f32.mrb[86].mxu0 }
 0x20c   : > { %v1831_v56 = vadd.f32 %v1830_v23, %v1829_v59  ;;  %v1721_v36 = vpop.f32.mrb[87].mxu1  ;;  %v1833_v42 = vpop.f32.mrb[87].mxu0 }
 0x20d   : > { %v1342_v61 = vadd.f32 %v1341_v20, %v1311_v57  ;;  %v1033_v51 = vadd.f32 %v1719_v62, %v2925_v25  ;;  %v1722_v24 = vadd.f32 %v1721_v36, %v1720_v16  ;;  %v1834_v60 = vadd.f32 %v1833_v42, %v1832_v50 }
 0x20f   : > { %v1242_v31 = vadd.f32 %v1831_v56, %v1033_v51  ;;  %v1036_v58 = vadd.f32 %v1722_v24, %v2929_v0 }
 0x211   : > { %v1273_v2 = vadd.f32 %v1272_v4, %v1242_v31  ;;  %v1312_v5 = vmul.f32 %v1242_v31, %v1242_v31  ;;  %v1243_v10 = vadd.f32 %v1834_v60, %v1036_v58  ;;  %v1723_v26 = vpop.f32.mrb[88].mxu1  ;;  %v1835_v13 = vpop.f32.mrb[88].mxu0 }
 0x212   : > { %v1724_v30 = vpop.f32.mrb[89].mxu1  ;;  %v1836_v28 = vpop.f32.mrb[89].mxu0 }
 0x213   : > { %v1343_v41 = vadd.f32 %v1342_v61, %v1312_v5  ;;  %v1274_v14 = vadd.f32 %v1273_v2, %v1243_v10  ;;  %v1313_v53 = vmul.f32 %v1243_v10, %v1243_v10  ;;  %v1725_v49 = vadd.f32 %v1724_v30, %v1723_v26  ;;  %v1726_v21 = vpop.f32.mrb[90].mxu1  ;;  %v1838_v35 = vpop.f32.mrb[90].mxu0 }
 0x214   : > { %v1837_v7 = vadd.f32 %v1836_v28, %v1835_v13  ;;  %v1727_v25 = vpop.f32.mrb[91].mxu1  ;;  %v1839_v12 = vpop.f32.mrb[91].mxu0 }
 0x215   : > { %v1344_v33 = vadd.f32 %v1343_v41, %v1313_v53  ;;  %v1041_v44 = vadd.f32 %v1725_v49, %v2933_v37  ;;  %v1728_v0 = vadd.f32 %v1727_v25, %v1726_v21  ;;  %v1840_v27 = vadd.f32 %v1839_v12, %v1838_v35 }
 0x217   : > { %v1244_v39 = vadd.f32 %v1837_v7, %v1041_v44  ;;  %v1044_v6 = vadd.f32 %v1728_v0, %v2937_v48 }
 0x219   : > { %v1275_v19 = vadd.f32 %v1274_v14, %v1244_v39  ;;  %v1314_v52 = vmul.f32 %v1244_v39, %v1244_v39  ;;  %v1245_v40 = vadd.f32 %v1840_v27, %v1044_v6  ;;  %v1729_v29 = vpop.f32.mrb[92].mxu1  ;;  %v1841_v47 = vpop.f32.mrb[92].mxu0 }
 0x21a   : > { %v1730_v3 = vpop.f32.mrb[93].mxu1  ;;  %v1842_v11 = vpop.f32.mrb[93].mxu0 }
 0x21b   : > { %v1345_v8 = vadd.f32 %v1344_v33, %v1314_v52  ;;  %v1276_v22 = vadd.f32 %v1275_v19, %v1245_v40  ;;  %v1315_v38 = vmul.f32 %v1245_v40, %v1245_v40  ;;  %v1731_v55 = vadd.f32 %v1730_v3, %v1729_v29  ;;  %v1732_v18 = vpop.f32.mrb[94].mxu1  ;;  %v1844_v32 = vpop.f32.mrb[94].mxu0 }
 0x21c   : > { %v1843_v43 = vadd.f32 %v1842_v11, %v1841_v47  ;;  %v1733_v37 = vpop.f32.mrb[95].mxu1  ;;  %v1845_v34 = vpop.f32.mrb[95].mxu0 }
 0x21d   : > { %v1346_v1 = vadd.f32 %v1345_v8, %v1315_v38  ;;  %v1049_v48 = vadd.f32 %v1731_v55, %v2941_v17  ;;  %v1734_v9 = vadd.f32 %v1733_v37, %v1732_v18  ;;  %v1846_v45 = vadd.f32 %v1845_v34, %v1844_v32 }
 0x21f   : > { %v1246_v46 = vadd.f32 %v1843_v43, %v1049_v48  ;;  %v1052_v54 = vadd.f32 %v1734_v9, %v2945_v15 }
 0x221   : > { %v1277_v59 = vadd.f32 %v1276_v22, %v1246_v46  ;;  %v1316_v63 = vmul.f32 %v1246_v46, %v1246_v46  ;;  %v1247_v23 = vadd.f32 %v1846_v45, %v1052_v54 }
 0x223   : > { %v1347_v20 = vadd.f32 %v1346_v1, %v1316_v63  ;;  %v1278_v4 = vadd.f32 %v1277_v59, %v1247_v23  ;;  %v1317_v57 = vmul.f32 %v1247_v23, %v1247_v23 }
 0x225   : > { %v1279_v62 = vrot.slane %v1278_v4, 4  ;;  %v1348_v16 = vadd.f32 %v1347_v20, %v1317_v57 }
 0x227   : > { %v1280_v50 = vadd.f32 %v1279_v62, %v1278_v4  ;;  %v1349_v56 = vrot.slane %v1348_v16, 4 }
 0x229   : > { %v1281_v36 = vrot.slane %v1280_v50, 2  ;;  %v1350_v17 = vadd.f32 %v1349_v56, %v1348_v16 }
 0x22b   : > { %v1282_v42 = vadd.f32 %v1281_v36, %v1280_v50  ;;  %v1351_v61 = vrot.slane %v1350_v17, 2 }
 0x22d   : > { %v1283_v51 = vrot.slane %v1282_v42, 1  ;;  %v1352_v15 = vadd.f32 %v1351_v61, %v1350_v17 }
 0x22f   : > { %v1284_v24 = vadd.f32 %v1283_v51, %v1282_v42  ;;  %v1353_v60 = vrot.slane %v1352_v15, 1 }
 0x231   : > { %v1354_v31 = vadd.f32 %v1353_v60, %v1352_v15  ;;  %1285 = vst [vmem:[%s218_s17] sm:$0x1] %v1284_v24 }
 0x233   : > { %1355 = vst [vmem:[%s218_s17 + $0x1] sm:$0x1] %v1354_v31 }
 0x234   : > { %2065 = shalt.err (!%p2062_p2)
}
 0x235   : > { %s2066_s7 = scalar_lea.hbm %s2984_s23, 32  ;;  %s2070_s28 = scalar_lea.hbm %s3031_s3, 64 }
 0x236   : > { %p2067_p13 = scmp.ne.s32.totalorder %s2984_s23, %s2066_s7  ;;  %p2071_p4 = scmp.lt.u32.totalorder %s2984_s23, %s3031_s3 }
 0x237   : > { %p2072_p5 = scmp.lt.u32.totalorder %s2070_s28, %s2066_s7  ;;  %p2074_p11 = scmp.lt.u32.totalorder %s2066_s7, %s2984_s23 }
 0x238   : > { %p2068_p6 = pnand %p2067_p13, %p3193_p0 }
 0x239   : > { %p2073_p8 = por %p2072_p5, %p2071_p4 }
 0x23a   : > { %p2069_p10 = pneg %p2068_p6 }
 0x23b   : > { %p2075_p1 = por %p2074_p11, %p2073_p8 }
 0x23d   : > { %p2076_p3 = pnand %p2075_p1, %p2069_p10 }
 0x23f   : > { %2079 = shalt.err (!%p2076_p3)
}
 0x240   : > { %1873 = dma.vmem_to_hbm [thread:$0]  (%p3193_p0), %s2986_s24, 32, %s2984_s23, %s1357_s5  }
 0x241 PF: > { %s1382_s30 = sand.u32 1, %s2110_s12   ;;  %p3194_p7 = scmp.ne.s32.totalorder %s3080_s19, 0 }
 0x242   : > { %p3195_p9 = scmp.ge.s32.totalorder %s2122_s15, 2  ;;  %s1383_s18 = scalar_lea.sflag [#allocation4], %s1382_s30 }
 0x244   : > { %p1887_p12 = pnand %p3195_p9, %p3194_p7 }
 0x246   : > { %2105 = dma.done.wait (!%p1887_p12), %s1383_s18, 32  }
 0x247   : > { %2107 = vsyncadd (!%p1887_p12), %s1383_s18, 4294967264  ;;  %p17_p2 = scmp.ge.s32.totalorder %s2262_s4, 4   ;;  %s3196_s12 = smov %s2114_s13 }
 0x248   : > { %s3197_s13 = smov %s2118_s14  ;;  %s3198_s14 = smov %s2278_s9 }
 0x249   : > { %s3199_s15 = smov %s2262_s4  ;;  %19 = sbr.rel (!%p17_p2) target bundleno = 6 (0x6), region = 85 }
 0x250   :  { %1388 = vsyncpa [#allocation3], 1 }
 0x251   :  { %1390 = vsyncpa [#allocation3 + $0x1], 1 }
 0x252   :  { %1391 = vsyncpa [#allocation6], 1 }
 0x253   :  { %1392 = vsyncpa [#allocation4], 1 }
 0x254   :  { %1394 = vsyncpa [#allocation4 + $0x1], 1 }

</bundles_post_ra>
